<compile_context>
chip_gen: v7x
topology: tpu7x:2x2x1
jax: 0.10.0
libtpu: 0.0.40
codegen_flags: <defaults>
</compile_context>

<pallas_src>
import functools

import jax
import jax.numpy as jnp
from jax.experimental import pallas as pl
from jax.experimental.pallas import tpu as pltpu


def _vmem_limit_bytes():
    """Per-core VMEM budget: ~3/4 of physical, capped.

    v5e/v6e (128 MiB) -> 96 MiB, v7x (64 MiB) -> 48 MiB.  Falls back to the
    v7x-safe 48 MiB if the hardware query is unavailable.
    """
    try:
        cap = int(pltpu.get_tpu_info().vmem_capacity_bytes)
        return min(cap * 3 // 4, 100 * 1024 * 1024)
    except Exception:
        return 48 * 1024 * 1024


def _row_multiple(dtype):
    """Sublane granularity for the second-to-last block dim (8 f32, 16 bf16)."""
    return max(8, 32 // jnp.dtype(dtype).itemsize)


def _pick_tile(size, target, multiple=8):
    """Largest divisor of `size` that is <= target and a multiple of `multiple`.

    Falls back to the full `size` (a full-dim block is always layout-legal) or,
    for very large dims, to the largest plain divisor (masked codegen, correct).
    """
    cap = min(size, target)
    for cand in range(cap, 0, -1):
        if size % cand == 0 and cand % multiple == 0:
            return cand
    if size <= max(4 * target, 2048):
        return size
    for cand in range(cap, 0, -1):
        if size % cand == 0:
            return cand
    return size


def _lane_bcast(x, width):
    """Broadcast a lane-uniform (rows, L) array to (rows, width)."""
    lanes = x.shape[-1]
    if width == lanes:
        return x
    if width < lanes:
        return x[:, :width]
    reps = -(-width // lanes)
    t = jnp.tile(x, (1, reps))
    return t if t.shape[-1] == width else t[:, :width]


# ---------------------------------------------------------------------------
# Dense projections: 2-D (N-tile, M-tile) grid; weight block reused across the
# inner row axis; activations cast to the compute dtype inside the kernel.
# ---------------------------------------------------------------------------

def _matmul_kernel(x_ref, w_ref, o_ref, *, compute_dtype):
    x = x_ref[...].astype(compute_dtype)
    acc = jnp.dot(x, w_ref[...], preferred_element_type=jnp.float32)
    o_ref[...] = acc.astype(o_ref.dtype)


def _matmul_bias_kernel(x_ref, w_ref, b_ref, o_ref, *, compute_dtype):
    x = x_ref[...].astype(compute_dtype)
    acc = jnp.dot(x, w_ref[...], preferred_element_type=jnp.float32)
    o_ref[...] = (acc + b_ref[...].astype(jnp.float32)).astype(o_ref.dtype)


def _matmul(x2d, w, bias=None, *, out_dtype, compute_dtype, vmem_limit,
            tm_target=512, tn_target=1536):
    """y = x2d @ w (+ bias).  Grid (n_tiles, m_tiles); full-K weight block."""
    m, kdim = x2d.shape
    kdim2, nn = w.shape
    assert kdim == kdim2
    tm = _pick_tile(m, tm_target, multiple=_row_multiple(x2d.dtype))
    tn = _pick_tile(nn, tn_target, multiple=128)
    grid = (nn // tn, m // tm)  # weight tile on the outer axis -> reused inner.

    in_specs = [
        pl.BlockSpec((tm, kdim), lambda j, i: (i, 0)),   # activation row tile
        pl.BlockSpec((kdim, tn), lambda j, i: (0, j)),   # weight column tile
    ]
    args = [x2d, w]
    if bias is not None:
        in_specs.append(pl.BlockSpec((1, tn), lambda j, i: (0, j)))
        args.append(bias.reshape(1, nn))
        kernel = functools.partial(_matmul_bias_kernel, compute_dtype=compute_dtype)
    else:
        kernel = functools.partial(_matmul_kernel, compute_dtype=compute_dtype)

    return pl.pallas_call(
        kernel,
        out_shape=jax.ShapeDtypeStruct((m, nn), out_dtype),
        grid_spec=pltpu.PrefetchScalarGridSpec(
            num_scalar_prefetch=0,
            grid=grid,
            in_specs=in_specs,
            out_specs=pl.BlockSpec((tm, tn), lambda j, i: (i, j)),
        ),
        compiler_params=pltpu.CompilerParams(
            dimension_semantics=("parallel", "parallel"),
            vmem_limit_bytes=vmem_limit),
    )(*args)


# ---------------------------------------------------------------------------
# Flash attention straight off the (b*n, 3*dim) QKV buffer, all heads packed.
# ---------------------------------------------------------------------------

def _flash_body(q_slab, k_slab, v_slab, o_ref, m_scr, l_scr, acc_scr, *,
                heads, d, scale, q_off, k_off, v_off, exp_dtype, approx_recip):
    kv_axis = 2
    ki = pl.program_id(kv_axis)
    tkv = k_slab.shape[0]

    @pl.when(ki == 0)
    def _():
        m_scr[...] = jnp.full_like(m_scr, -jnp.inf)
        l_scr[...] = jnp.zeros_like(l_scr)
        acc_scr[...] = jnp.zeros_like(acc_scr)

    scale_c = jnp.asarray(scale, dtype=q_slab.dtype)

    # Head groups whose merged width is ~128 lanes so accumulator / output
    # stores stay lane-dense even for small head_dim.
    hg = min(heads, max(1, 128 // d)) if d < 128 else 1

    for g0 in range(0, heads, hg):
        g1 = min(heads, g0 + hg)
        pv_parts, alpha_parts = [], []
        for h in range(g0, g1):
            # Fold the softmax scale into q (tq*d mults instead of tq*tkv).
            q_h = q_slab[:, q_off + h * d: q_off + (h + 1) * d] * scale_c   # (tq, d)
            k_h = k_slab[:, k_off + h * d: k_off + (h + 1) * d]             # (tkv, d)
            v_h = v_slab[:, v_off + h * d: v_off + (h + 1) * d]             # (tkv, d)

            # Scores via dot_general contracting the last dims (no K transpose).
            s = jax.lax.dot_general(q_h, k_h, (((1,), (1,)), ((), ())),
                                    preferred_element_type=jnp.float32)     # (tq, tkv)

            # TODO(synk): the optional `mask` (masked_fill with -inf) would be
            # applied to `s` right here, before the online-softmax update.

            m_prev = m_scr[h]                                               # (tq, 128)
            l_prev = l_scr[h]                                               # (tq, 128)
            m_next = jnp.maximum(m_prev, jnp.max(s, axis=-1, keepdims=True))
            alpha = jnp.exp(m_prev - m_next)                                # f32
            p = jnp.exp((s - _lane_bcast(m_next, tkv)).astype(exp_dtype))
            l_scr[h] = alpha * l_prev + jnp.sum(p.astype(jnp.float32),
                                                axis=-1, keepdims=True)
            m_scr[h] = m_next

            pv_parts.append(jnp.dot(p.astype(v_h.dtype), v_h,
                                    preferred_element_type=jnp.float32))    # (tq, d)
            alpha_parts.append(_lane_bcast(alpha, d))                       # (tq, d)

        lo, hi = g0 * d, g1 * d
        pv_g = pv_parts[0] if len(pv_parts) == 1 else jnp.concatenate(pv_parts, axis=-1)
        al_g = alpha_parts[0] if len(alpha_parts) == 1 else jnp.concatenate(alpha_parts, axis=-1)
        acc_scr[:, lo:hi] = al_g * acc_scr[:, lo:hi] + pv_g                 # lane-dense

    @pl.when(ki == pl.num_programs(kv_axis) - 1)
    def _():
        for g0 in range(0, heads, hg):
            g1 = min(heads, g0 + hg)
            inv_parts = [_lane_bcast(pl.reciprocal(l_scr[h], approx=approx_recip), d)
                         for h in range(g0, g1)]
            inv_g = inv_parts[0] if len(inv_parts) == 1 else jnp.concatenate(inv_parts, axis=-1)
            lo, hi = g0 * d, g1 * d
            o_ref[:, lo:hi] = (acc_scr[:, lo:hi] * inv_g).astype(o_ref.dtype)


def _flash_kernel_split(q_ref, k_ref, v_ref, o_ref, m_scr, l_scr, acc_scr, *,
                        heads, d, scale, exp_dtype, approx_recip):
    _flash_body(q_ref[...], k_ref[...], v_ref[...], o_ref, m_scr, l_scr, acc_scr,
                heads=heads, d=d, scale=scale, q_off=0, k_off=0, v_off=0,
                exp_dtype=exp_dtype, approx_recip=approx_recip)


def _flash_kernel_fused(q_slab_ref, kv_slab_ref, o_ref, m_scr, l_scr, acc_scr, *,
                        heads, d, dim, scale, exp_dtype, approx_recip):
    kv = kv_slab_ref[...]
    _flash_body(q_slab_ref[...], kv, kv, o_ref, m_scr, l_scr, acc_scr,
                heads=heads, d=d, scale=scale, q_off=0, k_off=dim, v_off=2 * dim,
                exp_dtype=exp_dtype, approx_recip=approx_recip)


def _flash_attention(qkv2d, *, batch, n, heads, d, scale, out_dtype,
                     exp_dtype, approx_recip, vmem_limit,
                     tq_target=256, tkv_target=256):
    dim = heads * d
    rows, width = qkv2d.shape
    assert rows == batch * n and width == 3 * dim

    rm = _row_multiple(qkv2d.dtype)
    tq = _pick_tile(n, tq_target, multiple=rm)
    tkv = _pick_tile(n, tkv_target, multiple=rm)
    nq, nkv = n // tq, n // tkv
    grid = (batch, nq, nkv)

    aligned = (dim % 128 == 0)
    if aligned:
        # Exact column blocks: q at column-block 0, k at 1, v at 2.
        kernel = functools.partial(_flash_kernel_split, heads=heads, d=d,
                                   scale=scale, exp_dtype=exp_dtype,
                                   approx_recip=approx_recip)
        in_specs = [
            pl.BlockSpec((tq, dim), lambda b, qi, ki: (b * nq + qi, 0)),
            pl.BlockSpec((tkv, dim), lambda b, qi, ki: (b * nkv + ki, 1)),
            pl.BlockSpec((tkv, dim), lambda b, qi, ki: (b * nkv + ki, 2)),
        ]
        args = (qkv2d, qkv2d, qkv2d)
    else:
        # Full-width slabs (always (8,128)-layout legal for any dim).
        kernel = functools.partial(_flash_kernel_fused, heads=heads, d=d, dim=dim,
                                   scale=scale, exp_dtype=exp_dtype,
                                   approx_recip=approx_recip)
        in_specs = [
            pl.BlockSpec((tq, 3 * dim), lambda b, qi, ki: (b * nq + qi, 0)),
            pl.BlockSpec((tkv, 3 * dim), lambda b, qi, ki: (b * nkv + ki, 0)),
        ]
        args = (qkv2d, qkv2d)

    return pl.pallas_call(
        kernel,
        out_shape=jax.ShapeDtypeStruct((batch * n, dim), out_dtype),
        grid_spec=pltpu.PrefetchScalarGridSpec(
            num_scalar_prefetch=0,
            grid=grid,
            in_specs=in_specs,
            out_specs=pl.BlockSpec((tq, dim), lambda b, qi, ki: (b * nq + qi, 0)),
            scratch_shapes=[
                pltpu.VMEM((heads, tq, 128), jnp.float32),   # running max (lane-broadcast)
                pltpu.VMEM((heads, tq, 128), jnp.float32),   # running denom (lane-broadcast)
                pltpu.VMEM((tq, dim), jnp.float32),          # merged-head accumulator
            ],
        ),
        compiler_params=pltpu.CompilerParams(
            dimension_semantics=("parallel", "parallel", "arbitrary"),
            vmem_limit_bytes=vmem_limit),
    )(*args)


# ---------------------------------------------------------------------------
# Full forward pass.
# ---------------------------------------------------------------------------

def attention_forward(x, w_qkv, w_out, b_out, *, heads, mask=None,
                      compute_dtype=jnp.bfloat16, exp_in_compute_dtype=False):
    assert mask is None  # TODO(synk): mask path not implemented.
    b, n, dim = x.shape
    assert dim % heads == 0
    d = dim // heads
    scale = float(dim) ** (-0.5)   # full `dim`, exactly as the PyTorch module
    cd = jnp.dtype(compute_dtype)
    vmem_limit = _vmem_limit_bytes()

    # Weights: cast only if not already in the compute dtype (callers should
    # pre-cast / cache them so the hot path does zero weight casts).
    w_qkv_c = w_qkv if w_qkv.dtype == cd else w_qkv.astype(cd)
    w_out_c = w_out if w_out.dtype == cd else w_out.astype(cd)
    b_out_c = b_out if b_out.dtype == jnp.dtype(jnp.float32) else b_out.astype(jnp.float32)

    # 1) QKV projection: one (b*n, dim) @ (dim, 3*dim) matmul; x cast in-kernel.
    x2d = x.reshape(b * n, dim)
    qkv = _matmul(x2d, w_qkv_c, out_dtype=cd, compute_dtype=cd,
                  vmem_limit=vmem_limit)                       # (b*n, 3*dim)

    # 2) Flash attention straight off the QKV buffer; output already merged
    #    as (b*n, dim) — no head split/merge transposes anywhere.
    if cd == jnp.dtype(jnp.float32):
        exp_dtype, approx = jnp.float32, False
    else:
        # bf16 exp relieves the EUP on v6e/v7x; keep f32 by default (and
        # always on v5e, which has no bf16 EUP/VPU path).
        exp_dtype = cd if exp_in_compute_dtype else jnp.float32
        approx = True
    o2d = _flash_attention(qkv, batch=b, n=n, heads=heads, d=d, scale=scale,
                           out_dtype=cd, exp_dtype=exp_dtype,
                           approx_recip=approx, vmem_limit=vmem_limit)

    # 3) Output projection + bias (Dropout(0.0) is identity); f32 output.
    out = _matmul(o2d, w_out_c, bias=b_out_c, out_dtype=x.dtype,
                  compute_dtype=cd, vmem_limit=vmem_limit)
    return out.reshape(b, n, dim)


def attention_reference(x, w_qkv, w_out, b_out, *, heads):
    """Pure-JAX f32 reference mirroring the PyTorch forward."""
    b, n, dim = x.shape
    d = dim // heads
    scale = float(dim) ** (-0.5)
    qkv = x @ w_qkv
    q, k, v = jnp.split(qkv, 3, axis=-1)

    def to_heads(t):  # 'b n (h d) -> b h n d'
        return t.reshape(b, n, heads, d).transpose(0, 2, 1, 3)

    q, k, v = map(to_heads, (q, k, v))
    dots = jnp.einsum('bhid,bhjd->bhij', q, k) * scale
    attn = jax.nn.softmax(dots, axis=-1)
    out = jnp.einsum('bhij,bhjd->bhid', attn, v)
    out = out.transpose(0, 2, 1, 3).reshape(b, n, dim)
    return out @ w_out + b_out


if __name__ == "__main__":
    def run_case(batch, seq, dim, heads, key):
        kx, kqkv, kwo, kbo = jax.random.split(key, 4)
        x = jax.random.normal(kx, (batch, seq, dim), dtype=jnp.float32)
        w_qkv = jax.random.normal(kqkv, (dim, 3 * dim), dtype=jnp.float32) * 0.05
        w_out = jax.random.normal(kwo, (dim, dim), dtype=jnp.float32) * 0.05
        b_out = jax.random.normal(kbo, (dim,), dtype=jnp.float32) * 0.01

        ref = attention_reference(x, w_qkv, w_out, b_out, heads=heads)

        # Pure-f32 path: must match the reference tightly.
        fwd_f32 = jax.jit(functools.partial(attention_forward, heads=heads,
                                            compute_dtype=jnp.float32))
        out_f32 = jax.block_until_ready(fwd_f32(x, w_qkv, w_out, b_out))
        assert out_f32.shape == (batch, seq, dim)
        assert jnp.allclose(out_f32, ref, atol=1e-4, rtol=1e-4), "f32 mismatch vs reference"

        # Default bf16-MXU path with pre-cast (cached) weights: loose tolerance.
        w_qkv_b = w_qkv.astype(jnp.bfloat16)
        w_out_b = w_out.astype(jnp.bfloat16)
        fwd_bf16 = jax.jit(functools.partial(attention_forward, heads=heads,
                                             compute_dtype=jnp.bfloat16))
        out_bf16 = jax.block_until_ready(fwd_bf16(x, w_qkv_b, w_out_b, b_out))
        assert out_bf16.shape == (batch, seq, dim)
        assert jnp.allclose(out_bf16, ref, atol=2e-2, rtol=2e-2), "bf16 mismatch vs reference"

    key = jax.random.PRNGKey(0)
    k1, k2 = jax.random.split(key)
    # Case 1: dim not a multiple of 128 -> fused full-width slab path (d=8).
    run_case(batch=2, seq=16, dim=32, heads=4, key=k1)
    # Case 2: dim % 128 == 0 -> exact dim-wide column-block path (d=64).
    run_case(batch=1, seq=16, dim=128, heads=2, key=k2)
    print("KERNEL_OK")
</pallas_src>

<mosaic_0001>
module attributes {stable_mosaic.version = 11 : i64} {
  func.func @_matmul_bias_kernel(%arg0: i32, %arg1: i32, %arg2: memref<32x32xf32, #tpu.memory_space<vmem>>, %arg3: memref<32x32xf32, #tpu.memory_space<vmem>>, %arg4: memref<1x32xf32, #tpu.memory_space<vmem>>, %arg5: memref<32x32xf32, #tpu.memory_space<vmem>>) attributes {dimension_semantics = [#tpu.dimension_semantics<parallel>, #tpu.dimension_semantics<parallel>], iteration_bounds = array<i64: 1, 1>, scalar_prefetch = 0 : i64, scratch_operands = 0 : i64, tpu.core_type = #tpu.core_type<tc>, window_params = [{transform_indices = @transform_0, window_bounds = array<i64: 32, 32>}, {transform_indices = @transform_1, window_bounds = array<i64: 32, 32>}, {transform_indices = @transform_2, window_bounds = array<i64: 1, 32>}, {transform_indices = @transform_3, window_bounds = array<i64: 32, 32>}]} {
    %c0 = arith.constant 0 : index
    %c0_0 = arith.constant 0 : index
    %0 = vector.load %arg2[%c0, %c0_0] : memref<32x32xf32, #tpu.memory_space<vmem>>, vector<32x32xf32>
    %c0_1 = arith.constant 0 : index
    %c0_2 = arith.constant 0 : index
    %1 = vector.load %arg3[%c0_1, %c0_2] : memref<32x32xf32, #tpu.memory_space<vmem>>, vector<32x32xf32>
    %cst = arith.constant dense<0.000000e+00> : vector<32x32xf32>
    %2 = tpu.matmul %0, %1, %cst {dimension_numbers = #tpu.dot_dimension_numbers<[1], [0], [0], [1], [0, 0, 1, 1], [], []>} : vector<32x32xf32>, vector<32x32xf32>, vector<32x32xf32> -> vector<32x32xf32>
    %c0_3 = arith.constant 0 : index
    %c0_4 = arith.constant 0 : index
    %3 = vector.load %arg4[%c0_3, %c0_4] : memref<1x32xf32, #tpu.memory_space<vmem>>, vector<1x32xf32>
    %4 = vector.broadcast %3 : vector<1x32xf32> to vector<32x32xf32>
    %5 = arith.addf %2, %4 : vector<32x32xf32>
    %c0_5 = arith.constant 0 : index
    %c0_6 = arith.constant 0 : index
    %6 = vector.load %arg5[%c0_5, %c0_6] : memref<32x32xf32, #tpu.memory_space<vmem>>, vector<32x32xf32>
    tpu.vector_store %arg5[%c0_5, %c0_6], %5 {strides = array<i32>} : memref<32x32xf32, #tpu.memory_space<vmem>>, vector<32x32xf32>,
    return
  }
  func.func @transform_0(%arg0: i32, %arg1: i32) -> (i32, i32) {
    %c0_i32 = arith.constant 0 : i32
    %c0_i32_0 = arith.constant 0 : i32
    return %arg1, %c0_i32 : i32, i32
  }
  func.func @transform_1(%arg0: i32, %arg1: i32) -> (i32, i32) {
    %c0_i32 = arith.constant 0 : i32
    %c0_i32_0 = arith.constant 0 : i32
    return %c0_i32, %arg0 : i32, i32
  }
  func.func @transform_2(%arg0: i32, %arg1: i32) -> (i32, i32) {
    %c0_i32 = arith.constant 0 : i32
    %c0_i32_0 = arith.constant 0 : i32
    return %c0_i32, %arg0 : i32, i32
  }
  func.func @transform_3(%arg0: i32, %arg1: i32) -> (i32, i32) {
    %c0_i32 = arith.constant 0 : i32
    return %arg1, %arg0 : i32, i32
  }
}

module attributes {stable_mosaic.version = 11 : i64} {
  func.func @_matmul_kernel(%arg0: i32, %arg1: i32, %arg2: memref<32x32xf32, #tpu.memory_space<vmem>>, %arg3: memref<32x96xf32, #tpu.memory_space<vmem>>, %arg4: memref<32x96xf32, #tpu.memory_space<vmem>>) attributes {dimension_semantics = [#tpu.dimension_semantics<parallel>, #tpu.dimension_semantics<parallel>], iteration_bounds = array<i64: 1, 1>, scalar_prefetch = 0 : i64, scratch_operands = 0 : i64, tpu.core_type = #tpu.core_type<tc>, window_params = [{transform_indices = @transform_0, window_bounds = array<i64: 32, 32>}, {transform_indices = @transform_1, window_bounds = array<i64: 32, 96>}, {transform_indices = @transform_2, window_bounds = array<i64: 32, 96>}]} {
    %c0 = arith.constant 0 : index
    %c0_0 = arith.constant 0 : index
    %0 = vector.load %arg2[%c0, %c0_0] : memref<32x32xf32, #tpu.memory_space<vmem>>, vector<32x32xf32>
    %c0_1 = arith.constant 0 : index
    %c0_2 = arith.constant 0 : index
    %1 = vector.load %arg3[%c0_1, %c0_2] : memref<32x96xf32, #tpu.memory_space<vmem>>, vector<32x96xf32>
    %cst = arith.constant dense<0.000000e+00> : vector<32x96xf32>
    %2 = tpu.matmul %0, %1, %cst {dimension_numbers = #tpu.dot_dimension_numbers<[1], [0], [0], [1], [0, 0, 1, 1], [], []>} : vector<32x32xf32>, vector<32x96xf32>, vector<32x96xf32> -> vector<32x96xf32>
    %c0_3 = arith.constant 0 : index
    %c0_4 = arith.constant 0 : index
    %3 = vector.load %arg4[%c0_3, %c0_4] : memref<32x96xf32, #tpu.memory_space<vmem>>, vector<32x96xf32>
    tpu.vector_store %arg4[%c0_3, %c0_4], %2 {strides = array<i32>} : memref<32x96xf32, #tpu.memory_space<vmem>>, vector<32x96xf32>,
    return
  }
  func.func @transform_0(%arg0: i32, %arg1: i32) -> (i32, i32) {
    %c0_i32 = arith.constant 0 : i32
    %c0_i32_0 = arith.constant 0 : i32
    return %arg1, %c0_i32 : i32, i32
  }
  func.func @transform_1(%arg0: i32, %arg1: i32) -> (i32, i32) {
    %c0_i32 = arith.constant 0 : i32
    %c0_i32_0 = arith.constant 0 : i32
    return %c0_i32, %arg0 : i32, i32
  }
  func.func @transform_2(%arg0: i32, %arg1: i32) -> (i32, i32) {
    %c0_i32 = arith.constant 0 : i32
    return %arg1, %arg0 : i32, i32
  }
}

module attributes {stable_mosaic.version = 11 : i64} {
  func.func @_flash_kernel_fused(%arg0: i32, %arg1: i32, %arg2: i32, %arg3: memref<16x96xf32, #tpu.memory_space<vmem>>, %arg4: memref<16x96xf32, #tpu.memory_space<vmem>>, %arg5: memref<16x32xf32, #tpu.memory_space<vmem>>, %arg6: memref<4x16x128xf32, #tpu.memory_space<vmem>>, %arg7: memref<4x16x128xf32, #tpu.memory_space<vmem>>, %arg8: memref<16x32xf32, #tpu.memory_space<vmem>>) attributes {dimension_semantics = [#tpu.dimension_semantics<parallel>, #tpu.dimension_semantics<parallel>, #tpu.dimension_semantics<arbitrary>], iteration_bounds = array<i64: 2, 1, 1>, scalar_prefetch = 0 : i64, scratch_operands = 3 : i64, tpu.core_type = #tpu.core_type<tc>, window_params = [{transform_indices = @transform_0, window_bounds = array<i64: 16, 96>}, {transform_indices = @transform_1, window_bounds = array<i64: 16, 96>}, {transform_indices = @transform_2, window_bounds = array<i64: 16, 32>}]} {
    %c0 = arith.constant 0 : index
    %c0_0 = arith.constant 0 : index
    %0 = vector.load %arg4[%c0, %c0_0] : memref<16x96xf32, #tpu.memory_space<vmem>>, vector<16x96xf32>
    %c0_1 = arith.constant 0 : index
    %c0_2 = arith.constant 0 : index
    %1 = vector.load %arg3[%c0_1, %c0_2] : memref<16x96xf32, #tpu.memory_space<vmem>>, vector<16x96xf32>
    %c0_i32 = arith.constant 0 : i32
    %2 = arith.cmpi eq, %arg2, %c0_i32 : i32
    %3 = arith.extui %2 : i1 to i32
    %c0_i32_3 = arith.constant 0 : i32
    %4 = arith.cmpi ne, %3, %c0_i32_3 : i32
    scf.if %4 {
      %cst_74 = arith.constant 0xFF800000 : f32
      %142 = vector.broadcast %cst_74 : f32 to vector<4x16x128xf32>
      %c0_75 = arith.constant 0 : index
      %c0_76 = arith.constant 0 : index
      %c0_77 = arith.constant 0 : index
      %143 = vector.load %arg6[%c0_75, %c0_76, %c0_77] : memref<4x16x128xf32, #tpu.memory_space<vmem>>, vector<4x16x128xf32>
      tpu.vector_store %arg6[%c0_75, %c0_76, %c0_77], %142 {strides = array<i32>} : memref<4x16x128xf32, #tpu.memory_space<vmem>>, vector<4x16x128xf32>,
      %cst_78 = arith.constant 0.000000e+00 : f32
      %144 = vector.broadcast %cst_78 : f32 to vector<4x16x128xf32>
      %c0_79 = arith.constant 0 : index
      %c0_80 = arith.constant 0 : index
      %c0_81 = arith.constant 0 : index
      %145 = vector.load %arg7[%c0_79, %c0_80, %c0_81] : memref<4x16x128xf32, #tpu.memory_space<vmem>>, vector<4x16x128xf32>
      tpu.vector_store %arg7[%c0_79, %c0_80, %c0_81], %144 {strides = array<i32>} : memref<4x16x128xf32, #tpu.memory_space<vmem>>, vector<4x16x128xf32>,
      %cst_82 = arith.constant 0.000000e+00 : f32
      %146 = vector.broadcast %cst_82 : f32 to vector<16x32xf32>
      %c0_83 = arith.constant 0 : index
      %c0_84 = arith.constant 0 : index
      %147 = vector.load %arg8[%c0_83, %c0_84] : memref<16x32xf32, #tpu.memory_space<vmem>>, vector<16x32xf32>
      tpu.vector_store %arg8[%c0_83, %c0_84], %146 {strides = array<i32>} : memref<16x32xf32, #tpu.memory_space<vmem>>, vector<16x32xf32>,
    } else {
    }
    %5 = vector.extract_strided_slice %1 {offsets = [0, 0], sizes = [16, 8], strides = [1, 1]} : vector<16x96xf32> to vector<16x8xf32>
    %cst = arith.constant 0.176776692 : f32
    %6 = vector.broadcast %cst : f32 to vector<16x8xf32>
    %7 = arith.mulf %5, %6 : vector<16x8xf32>
    %8 = vector.extract_strided_slice %0 {offsets = [0, 32], sizes = [16, 8], strides = [1, 1]} : vector<16x96xf32> to vector<16x8xf32>
    %9 = vector.extract_strided_slice %0 {offsets = [0, 64], sizes = [16, 8], strides = [1, 1]} : vector<16x96xf32> to vector<16x8xf32>
    %cst_4 = arith.constant dense<0.000000e+00> : vector<16x16xf32>
    %10 = tpu.matmul %7, %8, %cst_4 {dimension_numbers = #tpu.dot_dimension_numbers<[1], [1], [0], [0], [0, 0, 1, 0], [], []>} : vector<16x8xf32>, vector<16x8xf32>, vector<16x16xf32> -> vector<16x16xf32>
    %c0_5 = arith.constant 0 : index
    %c0_6 = arith.constant 0 : index
    %c0_7 = arith.constant 0 : index
    %11 = vector.load %arg6[%c0_5, %c0_6, %c0_7] : memref<4x16x128xf32, #tpu.memory_space<vmem>>, vector<1x16x128xf32>
    %12 = vector.shape_cast %11 : vector<1x16x128xf32> to vector<16x128xf32>
    %c0_8 = arith.constant 0 : index
    %c0_9 = arith.constant 0 : index
    %c0_10 = arith.constant 0 : index
    %13 = vector.load %arg7[%c0_8, %c0_9, %c0_10] : memref<4x16x128xf32, #tpu.memory_space<vmem>>, vector<1x16x128xf32>
    %14 = vector.shape_cast %13 : vector<1x16x128xf32> to vector<16x128xf32>
    %cst_11 = arith.constant dense<0xFF800000> : vector<16xf32>
    %15 = vector.multi_reduction <maximumf>, %10, %cst_11 [1] : vector<16x16xf32> to vector<16xf32>
    %16 = vector.shape_cast %15 : vector<16xf32> to vector<16x1xf32>
    %17 = vector.broadcast %16 : vector<16x1xf32> to vector<16x128xf32>
    %18 = arith.maximumf %12, %17 : vector<16x128xf32>
    %19 = arith.subf %12, %18 : vector<16x128xf32>
    %20 = math.exp %19 : vector<16x128xf32>
    %21 = vector.extract_strided_slice %18 {offsets = [0, 0], sizes = [16, 16], strides = [1, 1]} : vector<16x128xf32> to vector<16x16xf32>
    %22 = arith.subf %10, %21 : vector<16x16xf32>
    %23 = math.exp %22 : vector<16x16xf32>
    %24 = arith.mulf %20, %14 : vector<16x128xf32>
    %cst_12 = arith.constant dense<0.000000e+00> : vector<16xf32>
    %25 = vector.multi_reduction <add>, %23, %cst_12 [1] : vector<16x16xf32> to vector<16xf32>
    %26 = vector.shape_cast %25 : vector<16xf32> to vector<16x1xf32>
    %27 = vector.broadcast %26 : vector<16x1xf32> to vector<16x128xf32>
    %28 = arith.addf %24, %27 : vector<16x128xf32>
    %c0_13 = arith.constant 0 : index
    %c0_14 = arith.constant 0 : index
    %c0_15 = arith.constant 0 : index
    %29 = vector.load %arg7[%c0_13, %c0_14, %c0_15] : memref<4x16x128xf32, #tpu.memory_space<vmem>>, vector<1x16x128xf32>
    %30 = vector.shape_cast %29 : vector<1x16x128xf32> to vector<16x128xf32>
    %31 = vector.shape_cast %28 : vector<16x128xf32> to vector<1x16x128xf32>
    tpu.vector_store %arg7[%c0_13, %c0_14, %c0_15], %31 {strides = array<i32>} : memref<4x16x128xf32, #tpu.memory_space<vmem>>, vector<1x16x128xf32>,
    %c0_16 = arith.constant 0 : index
    %c0_17 = arith.constant 0 : index
    %c0_18 = arith.constant 0 : index
    %32 = vector.load %arg6[%c0_16, %c0_17, %c0_18] : memref<4x16x128xf32, #tpu.memory_space<vmem>>, vector<1x16x128xf32>
    %33 = vector.shape_cast %32 : vector<1x16x128xf32> to vector<16x128xf32>
    %34 = vector.shape_cast %18 : vector<16x128xf32> to vector<1x16x128xf32>
    tpu.vector_store %arg6[%c0_16, %c0_17, %c0_18], %34 {strides = array<i32>} : memref<4x16x128xf32, #tpu.memory_space<vmem>>, vector<1x16x128xf32>,
    %cst_19 = arith.constant dense<0.000000e+00> : vector<16x8xf32>
    %35 = tpu.matmul %23, %9, %cst_19 {dimension_numbers = #tpu.dot_dimension_numbers<[1], [0], [0], [1], [0, 0, 1, 1], [], []>} : vector<16x16xf32>, vector<16x8xf32>, vector<16x8xf32> -> vector<16x8xf32>
    %36 = vector.extract_strided_slice %20 {offsets = [0, 0], sizes = [16, 8], strides = [1, 1]} : vector<16x128xf32> to vector<16x8xf32>
    %37 = vector.extract_strided_slice %1 {offsets = [0, 8], sizes = [16, 8], strides = [1, 1]} : vector<16x96xf32> to vector<16x8xf32>
    %cst_20 = arith.constant 0.176776692 : f32
    %38 = vector.broadcast %cst_20 : f32 to vector<16x8xf32>
    %39 = arith.mulf %37, %38 : vector<16x8xf32>
    %40 = vector.extract_strided_slice %0 {offsets = [0, 40], sizes = [16, 8], strides = [1, 1]} : vector<16x96xf32> to vector<16x8xf32>
    %41 = vector.extract_strided_slice %0 {offsets = [0, 72], sizes = [16, 8], strides = [1, 1]} : vector<16x96xf32> to vector<16x8xf32>
    %cst_21 = arith.constant dense<0.000000e+00> : vector<16x16xf32>
    %42 = tpu.matmul %39, %40, %cst_21 {dimension_numbers = #tpu.dot_dimension_numbers<[1], [1], [0], [0], [0, 0, 1, 0], [], []>} : vector<16x8xf32>, vector<16x8xf32>, vector<16x16xf32> -> vector<16x16xf32>
    %c1 = arith.constant 1 : index
    %c0_22 = arith.constant 0 : index
    %c0_23 = arith.constant 0 : index
    %43 = vector.load %arg6[%c1, %c0_22, %c0_23] : memref<4x16x128xf32, #tpu.memory_space<vmem>>, vector<1x16x128xf32>
    %44 = vector.shape_cast %43 : vector<1x16x128xf32> to vector<16x128xf32>
    %c1_24 = arith.constant 1 : index
    %c0_25 = arith.constant 0 : index
    %c0_26 = arith.constant 0 : index
    %45 = vector.load %arg7[%c1_24, %c0_25, %c0_26] : memref<4x16x128xf32, #tpu.memory_space<vmem>>, vector<1x16x128xf32>
    %46 = vector.shape_cast %45 : vector<1x16x128xf32> to vector<16x128xf32>
    %cst_27 = arith.constant dense<0xFF800000> : vector<16xf32>
    %47 = vector.multi_reduction <maximumf>, %42, %cst_27 [1] : vector<16x16xf32> to vector<16xf32>
    %48 = vector.shape_cast %47 : vector<16xf32> to vector<16x1xf32>
    %49 = vector.broadcast %48 : vector<16x1xf32> to vector<16x128xf32>
    %50 = arith.maximumf %44, %49 : vector<16x128xf32>
    %51 = arith.subf %44, %50 : vector<16x128xf32>
    %52 = math.exp %51 : vector<16x128xf32>
    %53 = vector.extract_strided_slice %50 {offsets = [0, 0], sizes = [16, 16], strides = [1, 1]} : vector<16x128xf32> to vector<16x16xf32>
    %54 = arith.subf %42, %53 : vector<16x16xf32>
    %55 = math.exp %54 : vector<16x16xf32>
    %56 = arith.mulf %52, %46 : vector<16x128xf32>
    %cst_28 = arith.constant dense<0.000000e+00> : vector<16xf32>
    %57 = vector.multi_reduction <add>, %55, %cst_28 [1] : vector<16x16xf32> to vector<16xf32>
    %58 = vector.shape_cast %57 : vector<16xf32> to vector<16x1xf32>
    %59 = vector.broadcast %58 : vector<16x1xf32> to vector<16x128xf32>
    %60 = arith.addf %56, %59 : vector<16x128xf32>
    %c1_29 = arith.constant 1 : index
    %c0_30 = arith.constant 0 : index
    %c0_31 = arith.constant 0 : index
    %61 = vector.load %arg7[%c1_29, %c0_30, %c0_31] : memref<4x16x128xf32, #tpu.memory_space<vmem>>, vector<1x16x128xf32>
    %62 = vector.shape_cast %61 : vector<1x16x128xf32> to vector<16x128xf32>
    %63 = vector.shape_cast %60 : vector<16x128xf32> to vector<1x16x128xf32>
    tpu.vector_store %arg7[%c1_29, %c0_30, %c0_31], %63 {strides = array<i32>} : memref<4x16x128xf32, #tpu.memory_space<vmem>>, vector<1x16x128xf32>,
    %c1_32 = arith.constant 1 : index
    %c0_33 = arith.constant 0 : index
    %c0_34 = arith.constant 0 : index
    %64 = vector.load %arg6[%c1_32, %c0_33, %c0_34] : memref<4x16x128xf32, #tpu.memory_space<vmem>>, vector<1x16x128xf32>
    %65 = vector.shape_cast %64 : vector<1x16x128xf32> to vector<16x128xf32>
    %66 = vector.shape_cast %50 : vector<16x128xf32> to vector<1x16x128xf32>
    tpu.vector_store %arg6[%c1_32, %c0_33, %c0_34], %66 {strides = array<i32>} : memref<4x16x128xf32, #tpu.memory_space<vmem>>, vector<1x16x128xf32>,
    %cst_35 = arith.constant dense<0.000000e+00> : vector<16x8xf32>
    %67 = tpu.matmul %55, %41, %cst_35 {dimension_numbers = #tpu.dot_dimension_numbers<[1], [0], [0], [1], [0, 0, 1, 1], [], []>} : vector<16x16xf32>, vector<16x8xf32>, vector<16x8xf32> -> vector<16x8xf32>
    %68 = vector.extract_strided_slice %52 {offsets = [0, 0], sizes = [16, 8], strides = [1, 1]} : vector<16x128xf32> to vector<16x8xf32>
    %69 = vector.extract_strided_slice %1 {offsets = [0, 16], sizes = [16, 8], strides = [1, 1]} : vector<16x96xf32> to vector<16x8xf32>
    %cst_36 = arith.constant 0.176776692 : f32
    %70 = vector.broadcast %cst_36 : f32 to vector<16x8xf32>
    %71 = arith.mulf %69, %70 : vector<16x8xf32>
    %72 = vector.extract_strided_slice %0 {offsets = [0, 48], sizes = [16, 8], strides = [1, 1]} : vector<16x96xf32> to vector<16x8xf32>
    %73 = vector.extract_strided_slice %0 {offsets = [0, 80], sizes = [16, 8], strides = [1, 1]} : vector<16x96xf32> to vector<16x8xf32>
    %cst_37 = arith.constant dense<0.000000e+00> : vector<16x16xf32>
    %74 = tpu.matmul %71, %72, %cst_37 {dimension_numbers = #tpu.dot_dimension_numbers<[1], [1], [0], [0], [0, 0, 1, 0], [], []>} : vector<16x8xf32>, vector<16x8xf32>, vector<16x16xf32> -> vector<16x16xf32>
    %c2 = arith.constant 2 : index
    %c0_38 = arith.constant 0 : index
    %c0_39 = arith.constant 0 : index
    %75 = vector.load %arg6[%c2, %c0_38, %c0_39] : memref<4x16x128xf32, #tpu.memory_space<vmem>>, vector<1x16x128xf32>
    %76 = vector.shape_cast %75 : vector<1x16x128xf32> to vector<16x128xf32>
    %c2_40 = arith.constant 2 : index
    %c0_41 = arith.constant 0 : index
    %c0_42 = arith.constant 0 : index
    %77 = vector.load %arg7[%c2_40, %c0_41, %c0_42] : memref<4x16x128xf32, #tpu.memory_space<vmem>>, vector<1x16x128xf32>
    %78 = vector.shape_cast %77 : vector<1x16x128xf32> to vector<16x128xf32>
    %cst_43 = arith.constant dense<0xFF800000> : vector<16xf32>
    %79 = vector.multi_reduction <maximumf>, %74, %cst_43 [1] : vector<16x16xf32> to vector<16xf32>
    %80 = vector.shape_cast %79 : vector<16xf32> to vector<16x1xf32>
    %81 = vector.broadcast %80 : vector<16x1xf32> to vector<16x128xf32>
    %82 = arith.maximumf %76, %81 : vector<16x128xf32>
    %83 = arith.subf %76, %82 : vector<16x128xf32>
    %84 = math.exp %83 : vector<16x128xf32>
    %85 = vector.extract_strided_slice %82 {offsets = [0, 0], sizes = [16, 16], strides = [1, 1]} : vector<16x128xf32> to vector<16x16xf32>
    %86 = arith.subf %74, %85 : vector<16x16xf32>
    %87 = math.exp %86 : vector<16x16xf32>
    %88 = arith.mulf %84, %78 : vector<16x128xf32>
    %cst_44 = arith.constant dense<0.000000e+00> : vector<16xf32>
    %89 = vector.multi_reduction <add>, %87, %cst_44 [1] : vector<16x16xf32> to vector<16xf32>
    %90 = vector.shape_cast %89 : vector<16xf32> to vector<16x1xf32>
    %91 = vector.broadcast %90 : vector<16x1xf32> to vector<16x128xf32>
    %92 = arith.addf %88, %91 : vector<16x128xf32>
    %c2_45 = arith.constant 2 : index
    %c0_46 = arith.constant 0 : index
    %c0_47 = arith.constant 0 : index
    %93 = vector.load %arg7[%c2_45, %c0_46, %c0_47] : memref<4x16x128xf32, #tpu.memory_space<vmem>>, vector<1x16x128xf32>
    %94 = vector.shape_cast %93 : vector<1x16x128xf32> to vector<16x128xf32>
    %95 = vector.shape_cast %92 : vector<16x128xf32> to vector<1x16x128xf32>
    tpu.vector_store %arg7[%c2_45, %c0_46, %c0_47], %95 {strides = array<i32>} : memref<4x16x128xf32, #tpu.memory_space<vmem>>, vector<1x16x128xf32>,
    %c2_48 = arith.constant 2 : index
    %c0_49 = arith.constant 0 : index
    %c0_50 = arith.constant 0 : index
    %96 = vector.load %arg6[%c2_48, %c0_49, %c0_50] : memref<4x16x128xf32, #tpu.memory_space<vmem>>, vector<1x16x128xf32>
    %97 = vector.shape_cast %96 : vector<1x16x128xf32> to vector<16x128xf32>
    %98 = vector.shape_cast %82 : vector<16x128xf32> to vector<1x16x128xf32>
    tpu.vector_store %arg6[%c2_48, %c0_49, %c0_50], %98 {strides = array<i32>} : memref<4x16x128xf32, #tpu.memory_space<vmem>>, vector<1x16x128xf32>,
    %cst_51 = arith.constant dense<0.000000e+00> : vector<16x8xf32>
    %99 = tpu.matmul %87, %73, %cst_51 {dimension_numbers = #tpu.dot_dimension_numbers<[1], [0], [0], [1], [0, 0, 1, 1], [], []>} : vector<16x16xf32>, vector<16x8xf32>, vector<16x8xf32> -> vector<16x8xf32>
    %100 = vector.extract_strided_slice %84 {offsets = [0, 0], sizes = [16, 8], strides = [1, 1]} : vector<16x128xf32> to vector<16x8xf32>
    %101 = vector.extract_strided_slice %1 {offsets = [0, 24], sizes = [16, 8], strides = [1, 1]} : vector<16x96xf32> to vector<16x8xf32>
    %cst_52 = arith.constant 0.176776692 : f32
    %102 = vector.broadcast %cst_52 : f32 to vector<16x8xf32>
    %103 = arith.mulf %101, %102 : vector<16x8xf32>
    %104 = vector.extract_strided_slice %0 {offsets = [0, 56], sizes = [16, 8], strides = [1, 1]} : vector<16x96xf32> to vector<16x8xf32>
    %105 = vector.extract_strided_slice %0 {offsets = [0, 88], sizes = [16, 8], strides = [1, 1]} : vector<16x96xf32> to vector<16x8xf32>
    %cst_53 = arith.constant dense<0.000000e+00> : vector<16x16xf32>
    %106 = tpu.matmul %103, %104, %cst_53 {dimension_numbers = #tpu.dot_dimension_numbers<[1], [1], [0], [0], [0, 0, 1, 0], [], []>} : vector<16x8xf32>, vector<16x8xf32>, vector<16x16xf32> -> vector<16x16xf32>
    %c3 = arith.constant 3 : index
    %c0_54 = arith.constant 0 : index
    %c0_55 = arith.constant 0 : index
    %107 = vector.load %arg6[%c3, %c0_54, %c0_55] : memref<4x16x128xf32, #tpu.memory_space<vmem>>, vector<1x16x128xf32>
    %108 = vector.shape_cast %107 : vector<1x16x128xf32> to vector<16x128xf32>
    %c3_56 = arith.constant 3 : index
    %c0_57 = arith.constant 0 : index
    %c0_58 = arith.constant 0 : index
    %109 = vector.load %arg7[%c3_56, %c0_57, %c0_58] : memref<4x16x128xf32, #tpu.memory_space<vmem>>, vector<1x16x128xf32>
    %110 = vector.shape_cast %109 : vector<1x16x128xf32> to vector<16x128xf32>
    %cst_59 = arith.constant dense<0xFF800000> : vector<16xf32>
    %111 = vector.multi_reduction <maximumf>, %106, %cst_59 [1] : vector<16x16xf32> to vector<16xf32>
    %112 = vector.shape_cast %111 : vector<16xf32> to vector<16x1xf32>
    %113 = vector.broadcast %112 : vector<16x1xf32> to vector<16x128xf32>
    %114 = arith.maximumf %108, %113 : vector<16x128xf32>
    %115 = arith.subf %108, %114 : vector<16x128xf32>
    %116 = math.exp %115 : vector<16x128xf32>
    %117 = vector.extract_strided_slice %114 {offsets = [0, 0], sizes = [16, 16], strides = [1, 1]} : vector<16x128xf32> to vector<16x16xf32>
    %118 = arith.subf %106, %117 : vector<16x16xf32>
    %119 = math.exp %118 : vector<16x16xf32>
    %120 = arith.mulf %116, %110 : vector<16x128xf32>
    %cst_60 = arith.constant dense<0.000000e+00> : vector<16xf32>
    %121 = vector.multi_reduction <add>, %119, %cst_60 [1] : vector<16x16xf32> to vector<16xf32>
    %122 = vector.shape_cast %121 : vector<16xf32> to vector<16x1xf32>
    %123 = vector.broadcast %122 : vector<16x1xf32> to vector<16x128xf32>
    %124 = arith.addf %120, %123 : vector<16x128xf32>
    %c3_61 = arith.constant 3 : index
    %c0_62 = arith.constant 0 : index
    %c0_63 = arith.constant 0 : index
    %125 = vector.load %arg7[%c3_61, %c0_62, %c0_63] : memref<4x16x128xf32, #tpu.memory_space<vmem>>, vector<1x16x128xf32>
    %126 = vector.shape_cast %125 : vector<1x16x128xf32> to vector<16x128xf32>
    %127 = vector.shape_cast %124 : vector<16x128xf32> to vector<1x16x128xf32>
    tpu.vector_store %arg7[%c3_61, %c0_62, %c0_63], %127 {strides = array<i32>} : memref<4x16x128xf32, #tpu.memory_space<vmem>>, vector<1x16x128xf32>,
    %c3_64 = arith.constant 3 : index
    %c0_65 = arith.constant 0 : index
    %c0_66 = arith.constant 0 : index
    %128 = vector.load %arg6[%c3_64, %c0_65, %c0_66] : memref<4x16x128xf32, #tpu.memory_space<vmem>>, vector<1x16x128xf32>
    %129 = vector.shape_cast %128 : vector<1x16x128xf32> to vector<16x128xf32>
    %130 = vector.shape_cast %114 : vector<16x128xf32> to vector<1x16x128xf32>
    tpu.vector_store %arg6[%c3_64, %c0_65, %c0_66], %130 {strides = array<i32>} : memref<4x16x128xf32, #tpu.memory_space<vmem>>, vector<1x16x128xf32>,
    %cst_67 = arith.constant dense<0.000000e+00> : vector<16x8xf32>
    %131 = tpu.matmul %119, %105, %cst_67 {dimension_numbers = #tpu.dot_dimension_numbers<[1], [0], [0], [1], [0, 0, 1, 1], [], []>} : vector<16x16xf32>, vector<16x8xf32>, vector<16x8xf32> -> vector<16x8xf32>
    %132 = vector.extract_strided_slice %116 {offsets = [0, 0], sizes = [16, 8], strides = [1, 1]} : vector<16x128xf32> to vector<16x8xf32>
    %133 = tpu.concatenate %35, %67, %99, %131 in 1 : vector<16x8xf32>, vector<16x8xf32>, vector<16x8xf32>, vector<16x8xf32> -> vector<16x32xf32>
    %134 = tpu.concatenate %36, %68, %100, %132 in 1 : vector<16x8xf32>, vector<16x8xf32>, vector<16x8xf32>, vector<16x8xf32> -> vector<16x32xf32>
    %c0_68 = arith.constant 0 : index
    %c0_69 = arith.constant 0 : index
    %135 = vector.load %arg8[%c0_68, %c0_69] : memref<16x32xf32, #tpu.memory_space<vmem>>, vector<16x32xf32>
    %136 = arith.mulf %134, %135 : vector<16x32xf32>
    %137 = arith.addf %136, %133 : vector<16x32xf32>
    %c0_70 = arith.constant 0 : index
    %c0_71 = arith.constant 0 : index
    %138 = vector.load %arg8[%c0_70, %c0_71] : memref<16x32xf32, #tpu.memory_space<vmem>>, vector<16x32xf32>
    tpu.vector_store %arg8[%c0_70, %c0_71], %137 {strides = array<i32>} : memref<16x32xf32, #tpu.memory_space<vmem>>, vector<16x32xf32>,
    %c0_i32_72 = arith.constant 0 : i32
    %139 = arith.cmpi eq, %arg2, %c0_i32_72 : i32
    %140 = arith.extui %139 : i1 to i32
    %c0_i32_73 = arith.constant 0 : i32
    %141 = arith.cmpi ne, %140, %c0_i32_73 : i32
    scf.if %141 {
      %c0_74 = arith.constant 0 : index
      %c0_75 = arith.constant 0 : index
      %c0_76 = arith.constant 0 : index
      %142 = vector.load %arg7[%c0_74, %c0_75, %c0_76] : memref<4x16x128xf32, #tpu.memory_space<vmem>>, vector<1x16x128xf32>
      %143 = vector.shape_cast %142 : vector<1x16x128xf32> to vector<16x128xf32>
      %144 = tpu.reciprocal %143 : vector<16x128xf32> -> vector<16x128xf32>
      %145 = vector.extract_strided_slice %144 {offsets = [0, 0], sizes = [16, 8], strides = [1, 1]} : vector<16x128xf32> to vector<16x8xf32>
      %c1_77 = arith.constant 1 : index
      %c0_78 = arith.constant 0 : index
      %c0_79 = arith.constant 0 : index
      %146 = vector.load %arg7[%c1_77, %c0_78, %c0_79] : memref<4x16x128xf32, #tpu.memory_space<vmem>>, vector<1x16x128xf32>
      %147 = vector.shape_cast %146 : vector<1x16x128xf32> to vector<16x128xf32>
      %148 = tpu.reciprocal %147 : vector<16x128xf32> -> vector<16x128xf32>
      %149 = vector.extract_strided_slice %148 {offsets = [0, 0], sizes = [16, 8], strides = [1, 1]} : vector<16x128xf32> to vector<16x8xf32>
      %c2_80 = arith.constant 2 : index
      %c0_81 = arith.constant 0 : index
      %c0_82 = arith.constant 0 : index
      %150 = vector.load %arg7[%c2_80, %c0_81, %c0_82] : memref<4x16x128xf32, #tpu.memory_space<vmem>>, vector<1x16x128xf32>
      %151 = vector.shape_cast %150 : vector<1x16x128xf32> to vector<16x128xf32>
      %152 = tpu.reciprocal %151 : vector<16x128xf32> -> vector<16x128xf32>
      %153 = vector.extract_strided_slice %152 {offsets = [0, 0], sizes = [16, 8], strides = [1, 1]} : vector<16x128xf32> to vector<16x8xf32>
      %c3_83 = arith.constant 3 : index
      %c0_84 = arith.constant 0 : index
      %c0_85 = arith.constant 0 : index
      %154 = vector.load %arg7[%c3_83, %c0_84, %c0_85] : memref<4x16x128xf32, #tpu.memory_space<vmem>>, vector<1x16x128xf32>
      %155 = vector.shape_cast %154 : vector<1x16x128xf32> to vector<16x128xf32>
      %156 = tpu.reciprocal %155 : vector<16x128xf32> -> vector<16x128xf32>
      %157 = vector.extract_strided_slice %156 {offsets = [0, 0], sizes = [16, 8], strides = [1, 1]} : vector<16x128xf32> to vector<16x8xf32>
      %158 = tpu.concatenate %145, %149, %153, %157 in 1 : vector<16x8xf32>, vector<16x8xf32>, vector<16x8xf32>, vector<16x8xf32> -> vector<16x32xf32>
      %c0_86 = arith.constant 0 : index
      %c0_87 = arith.constant 0 : index
      %159 = vector.load %arg8[%c0_86, %c0_87] : memref<16x32xf32, #tpu.memory_space<vmem>>, vector<16x32xf32>
      %160 = arith.mulf %159, %158 : vector<16x32xf32>
      %c0_88 = arith.constant 0 : index
      %c0_89 = arith.constant 0 : index
      %161 = vector.load %arg5[%c0_88, %c0_89] : memref<16x32xf32, #tpu.memory_space<vmem>>, vector<16x32xf32>
      tpu.vector_store %arg5[%c0_88, %c0_89], %160 {strides = array<i32>} : memref<16x32xf32, #tpu.memory_space<vmem>>, vector<16x32xf32>,
    } else {
    }
    return
  }
  func.func @transform_0(%arg0: i32, %arg1: i32, %arg2: i32) -> (i32, i32) {
    %c1_i32 = arith.constant 1 : i32
    %0 = arith.muli %arg0, %c1_i32 : i32
    %1 = arith.addi %0, %arg1 : i32
    %c0_i32 = arith.constant 0 : i32
    %c0_i32_0 = arith.constant 0 : i32
    return %1, %c0_i32 : i32, i32
  }
  func.func @transform_1(%arg0: i32, %arg1: i32, %arg2: i32) -> (i32, i32) {
    %c1_i32 = arith.constant 1 : i32
    %0 = arith.muli %arg0, %c1_i32 : i32
    %1 = arith.addi %0, %arg2 : i32
    %c0_i32 = arith.constant 0 : i32
    %c0_i32_0 = arith.constant 0 : i32
    return %1, %c0_i32 : i32, i32
  }
  func.func @transform_2(%arg0: i32, %arg1: i32, %arg2: i32) -> (i32, i32) {
    %c1_i32 = arith.constant 1 : i32
    %0 = arith.muli %arg0, %c1_i32 : i32
    %1 = arith.addi %0, %arg1 : i32
    %c0_i32 = arith.constant 0 : i32
    %c0_i32_0 = arith.constant 0 : i32
    return %1, %c0_i32 : i32, i32
  }
}

</mosaic_0001>

<bundles_post_ra>
// kernel: attention_forward.5
= control target key start
LH: loop header
LB: loop body
LE: loop exit
PB: predicated region body
PF: predicated region fallthrough
CT: control target
= control target key end

     0   :  { %vm30_vm0 = vcmask 261120   ;;  %s284_s0 = inlined_call_operand.vmem [shape: f32[32,32], index: 0, kind: input, shape index: {}]   ;;  %s285_s1 = inlined_call_operand.vmem [shape: f32[32,32], index: 1, kind: input, shape index: {}]   ;;  %s286_s2 = inlined_call_operand.vmem [shape: f32[1,32], index: 2, kind: input, shape index: {}]   ;;  %s287_s3 = inlined_call_operand.hbm [shape: f32[32,32], index: 3, kind: output, shape index: {}]  }
   0x1   :  { %v19_v0 = vld [vmem:[%s285_s1] sm:$0xff]  ;;  %v20_v1 = vld [vmem:[%s285_s1 + $0x8] sm:$0xff]  ;;  %v21_v2 = vld [vmem:[%s285_s1 + $0x10] sm:$0xff] }
   0x2   :  { %v175_v3 = vpack.c.bf16 %v20_v1, %v19_v0  ;;  %v22_v4 = vld [vmem:[%s285_s1 + $0x18] sm:$0xff]  ;;  %v15_v5 = vld [vmem:[%s284_s0] sm:$0xff]  ;;  %v17_v6 = vld [vmem:[%s284_s0 + $0x10] sm:$0xff] }
   0x3   :  { %v179_v7 = vpack.c.bf16 %v22_v4, %v21_v2  ;;  %169 = vmatprep.mubr.msk.f32.mxu0 %vm30_vm0, %v15_v5  ;;  %172 = vmatprep.mubr.msk.f32.mxu1 %vm30_vm0, %v17_v6 }
   0x4   :  { %8 = vsyncpa [#allocation3], 0  ;;  %176 = vmatprep.subr.bf16.mxu0 %v175_v3  ;;  %183 = vmatprep.subr.bf16.mxu1 %v175_v3  ;;  %v16_v8 = vld [vmem:[%s284_s0 + $0x8] sm:$0xff]  ;;  %v18_v9 = vld [vmem:[%s284_s0 + $0x18] sm:$0xff]  ;;  %s214_s29 = smov [#allocation2]  }
   0x5   :  { %178 = vmatpush3.bf16.msra.mxu0 %v175_v3  ;;  %185 = vmatpush3.bf16.msra.mxu1 %v175_v3  ;;  %v148_v10 = vld [vmem:[%s286_s2] ss:$0 sm:$0xff]  ;;  %s137_s30 = sshll.u32 %s214_s29, 4  ;;  %s138_s30 = int_to_ptr.vmem [resolvable:$true] %s137_s30 }
   0x6   :  { %180 = vmatprep.subr.bf16.mxu0 %v179_v7  ;;  %184 = vmatprep.subr.bf16.mxu1 %v179_v7  ;;  %s190_s0 = scalar_lea.vmem %s138_s30, 512  ;;  %p195_p1 = scmp.lt.s32.totalorder %s138_s30, %s138_s30 }
   0x7   :  { %p191_p0 = scmp.ne.s32.totalorder %s138_s30, %s190_s0  ;;  %p196_p2 = scmp.lt.s32.totalorder %s190_s0, %s190_s0 }
   0x9   :  { %182 = vmatpush3.bf16.msra.mxu0 %v179_v7  ;;  %186 = vmatpush3.bf16.msra.mxu1 %v179_v7  ;;  %p197_p3 = por %p196_p2, %p195_p1 }
   0xb   :  { %p198_p4 = pnand %p197_p3, %p191_p0 }
   0xc   :  { %170 = vmatmul.mubr.msk.f32.vlgmr.msra.gmra.mrb[0].mxu0 %vm30_vm0, %v16_v8  ;;  %173 = vmatmul.mubr.msk.f32.vlgmr.msra.gmra.mrb[0].mxu1 %vm30_vm0, %v18_v9 }
  0xdf   :  { %v171_v11 = vpop.f32.mrb[0].mxu0  ;;  %v174_v12 = vpop.f32.mrb[0].mxu1 }
  0xe0   :  { %v115_v13 = vadd.f32 %v171_v11, %v148_v10  ;;  %v125_v14 = vadd.f32 %v174_v12, %v148_v10  ;;  %v109_v15 = vpop.f32.mrb[1].mxu0  ;;  %v119_v16 = vpop.f32.mrb[1].mxu1 }
  0xe1   :  { %v110_v17 = vadd.f32 %v148_v10, %v109_v15  ;;  %v120_v18 = vadd.f32 %v148_v10, %v119_v16 }
  0xe2   :  { %129 = vst.msk [vmem:[#allocation2 + $0x8] sm:$0xff] %vm30_vm0, %v115_v13  ;;  %131 = vst.msk [vmem:[#allocation2 + $0x18] sm:$0xff] %vm30_vm0, %v125_v14 }
  0xe3   :  { %128 = vst.msk [vmem:[#allocation2] sm:$0xff] %vm30_vm0, %v110_v17  ;;  %130 = vst.msk [vmem:[#allocation2 + $0x10] sm:$0xff] %vm30_vm0, %v120_v18 }
  0xe4   :  { %201 = shalt.err (!%p198_p4)
}
  0xe5   :  { %s202_s5 = scalar_lea.hbm %s287_s3, 512 }
  0xe6   :  { %p203_p5 = scmp.ne.s32.totalorder %s287_s3, %s202_s5  ;;  %p206_p6 = scmp.lt.u32.totalorder %s202_s5, %s287_s3 }
  0xe8   :  { %p208_p7 = pnand %p206_p6, %p203_p5 }
  0xea   :  { %211 = shalt.err (!%p208_p7)
}
  0xeb   :  { %s215_s10 = smov 128   ;;  %s216_s11 = smov 8  }
  0xec   :  { %143 = dma.vmem_to_hbm [thread:$0]  %s138_s30, 512, %s287_s3, [#allocation3], %s215_s10, %s215_s10, %s216_s11  }
  0xed   :  { %212 = dma.done.wait [#allocation3], 512  }
  0xee   :  { %213 = vsyncadd [#allocation3], 4294966784 }
  0xef   :  { %147 = vsyncpa [#allocation3], 1 }

// kernel: attention_forward.3
= control target key start
LH: loop header
LB: loop body
LE: loop exit
PB: predicated region body
PF: predicated region fallthrough
CT: control target
= control target key end

     0   :  { %7 = vsyncpa [#allocation3], 0  ;;  %s305_s0 = inlined_call_operand.hbm [shape: f32[32,32], index: 0, kind: input, shape index: {}]   ;;  %s306_s1 = inlined_call_operand.hbm [shape: f32[32,96], index: 1, kind: input, shape index: {}]   ;;  %s307_s2 = inlined_call_operand.vmem [shape: f32[32,96], index: 2, kind: output, shape index: {}]  }
   0x1   :  { %8 = vsyncpa [#allocation5], 0  ;;  %s246_s9 = smov [#allocation2]   ;;  %s198_s13 = scalar_lea.hbm %s305_s0, 512 }
   0x2   :  { %s14_s10 = sshll.u32 %s246_s9, 4  ;;  %p199_p0 = scmp.ne.s32.totalorder %s305_s0, %s198_s13  ;;  %s15_s10 = int_to_ptr.vmem [resolvable:$true] %s14_s10 }
   0x3   :  { %p202_p1 = scmp.lt.u32.totalorder %s198_s13, %s305_s0 }
   0x5   :  { %p204_p2 = pnand %p202_p1, %p199_p0 }
   0x7   :  { %207 = shalt.err (!%p204_p2)
}
   0x8   :  { %s208_s18 = scalar_lea.vmem %s15_s10, 512  ;;  %p213_p4 = scmp.lt.s32.totalorder %s15_s10, %s15_s10 }
   0x9   :  { %p209_p3 = scmp.ne.s32.totalorder %s15_s10, %s208_s18  ;;  %p214_p5 = scmp.lt.s32.totalorder %s208_s18, %s208_s18 }
   0xb   :  { %p215_p6 = por %p214_p5, %p213_p4 }
   0xd   :  { %p216_p7 = pnand %p215_p6, %p209_p3 }
   0xf   :  { %219 = shalt.err (!%p216_p7)
}
  0x10   :  { %s247_s19 = smov 128   ;;  %s248_s20 = smov 8  }
  0x11   :  { %20 = dma.hbm_to_vmem [thread:$0]  %s305_s0, 512, %s15_s10, [#allocation3], %s247_s19, %s247_s19, %s248_s20  }
  0x12   :  { %s249_s23 = smov [#allocation4]   ;;  %s220_s27 = scalar_lea.hbm %s306_s1, 512 }
  0x13   :  { %s26_s24 = sshll.u32 %s249_s23, 4  ;;  %p221_p8 = scmp.ne.s32.totalorder %s306_s1, %s220_s27  ;;  %s27_s24 = int_to_ptr.vmem [resolvable:$true] %s26_s24 }
  0x14   :  { %p224_p9 = scmp.lt.u32.totalorder %s220_s27, %s306_s1 }
  0x16   :  { %p226_p10 = pnand %p224_p9, %p221_p8 }
  0x18   :  { %229 = shalt.err (!%p226_p10)
}
  0x19   :  { %s230_s4 = scalar_lea.vmem %s27_s24, 512  ;;  %p235_p12 = scmp.lt.s32.totalorder %s27_s24, %s27_s24 }
  0x1a   :  { %p231_p11 = scmp.ne.s32.totalorder %s27_s24, %s230_s4  ;;  %p236_p13 = scmp.lt.s32.totalorder %s230_s4, %s230_s4 }
  0x1c   :  { %p237_p0 = por %p236_p13, %p235_p12 }
  0x1e   :  { %p238_p1 = pnand %p237_p0, %p231_p11 }
  0x20   :  { %241 = shalt.err (!%p238_p1)
}
  0x21   :  { %32 = dma.hbm_to_vmem [thread:$0]  %s306_s1, 512, %s27_s24, [#allocation5], %s247_s19, %s247_s19, %s248_s20  }
  0x22   :  { %242 = dma.done.wait [#allocation3], 512  }
  0x23   :  { %243 = vsyncadd [#allocation3], 4294966784 }
  0x24   :  { %244 = dma.done.wait [#allocation5], 512  }
  0x25   :  { %245 = vsyncadd [#allocation5], 4294966784  ;;  %vm47_vm0 = vcmask 261120   ;;  %v43_v0 = vld [vmem:[#allocation4] sm:$0xff]  ;;  %v44_v1 = vld [vmem:[#allocation4 + $0x8] sm:$0xff]  ;;  %vm145_vm1 = vcmask 785408  }
  0x26   :  { %v45_v2 = vld [vmem:[#allocation4 + $0x10] sm:$0xff]  ;;  %v182_v3 = vpack.c.bf16 %v44_v1, %v43_v0  ;;  %v46_v4 = vld [vmem:[#allocation4 + $0x18] sm:$0xff]  ;;  %v39_v5 = vld [vmem:[#allocation2] sm:$0xff] }
  0x27   :  { %v41_v6 = vld [vmem:[#allocation2 + $0x10] sm:$0xff]  ;;  %v186_v7 = vpack.c.bf16 %v46_v4, %v45_v2  ;;  %176 = vmatprep.mubr.msk.f32.mxu0 %vm47_vm0, %v39_v5  ;;  %v40_v8 = vld [vmem:[#allocation2 + $0x8] sm:$0xff]  ;;  %v42_v9 = vld [vmem:[#allocation2 + $0x18] sm:$0xff] }
  0x28   :  { %179 = vmatprep.mubr.msk.f32.mxu1 %vm47_vm0, %v41_v6  ;;  %183 = vmatprep.subr.bf16.mxu0 %v182_v3 }
  0x29   :  { %190 = vmatprep.subr.bf16.mxu1 %v182_v3  ;;  %185 = vmatpush3.bf16.msra.mxu0 %v182_v3 }
  0x2a   :  { %192 = vmatpush3.bf16.msra.mxu1 %v182_v3  ;;  %187 = vmatprep.subr.bf16.mxu0 %v186_v7 }
  0x2b   :  { %191 = vmatprep.subr.bf16.mxu1 %v186_v7 }
  0x2d   :  { %189 = vmatpush3.bf16.msra.mxu0 %v186_v7 }
  0x2e   :  { %193 = vmatpush3.bf16.msra.mxu1 %v186_v7 }
  0x30   :  { %177 = vmatmul.mubr.msk.f32.vlgmr.msra.gmra.mrb[0].mxu0 %vm47_vm0, %v40_v8 }
  0x31   :  { %180 = vmatmul.mubr.msk.f32.vlgmr.msra.gmra.mrb[0].mxu1 %vm47_vm0, %v42_v9 }
 0x103   :  { %v178_v10 = vpop.f32.mrb[0].mxu0 }
 0x104   :  { %v181_v11 = vpop.f32.mrb[0].mxu1  ;;  %147 = vst.msk [vmem:[%s307_s2 + $0x8] sm:$0xff] %vm145_vm1, %v178_v10  ;;  %v126_v12 = vpop.f32.mrb[1].mxu0 }
 0x105   :  { %149 = vst.msk [vmem:[%s307_s2 + $0x18] sm:$0xff] %vm145_vm1, %v181_v11  ;;  %v136_v13 = vpop.f32.mrb[1].mxu1  ;;  %146 = vst.msk [vmem:[%s307_s2] sm:$0xff] %vm145_vm1, %v126_v12 }
 0x106   :  { %148 = vst.msk [vmem:[%s307_s2 + $0x10] sm:$0xff] %vm145_vm1, %v136_v13 }
 0x107   :  { %154 = vsyncpa [#allocation3], 1 }
 0x108   :  { %155 = vsyncpa [#allocation5], 1 }

// kernel: attention_forward.4
= control target key start
LH: loop header
LB: loop body
LE: loop exit
PB: predicated region body
PF: predicated region fallthrough
CT: control target
= control target key end

     0   :  { %s1662_s9 = smov 0   ;;  %s1664_s10 = smov 0   ;;  %s1875_s0 = inlined_call_operand.vmem [shape: f32[32,96], index: 0, kind: input, shape index: {}, may-alias: {0,1}]   ;;  %s1876_s1 = inlined_call_operand.vmem [shape: f32[32,96], index: 1, kind: input, shape index: {}, may-alias: {0,1}]   ;;  %s1877_s2 = inlined_call_operand.vmem [shape: f32[32,32], index: 2, kind: output, shape index: {}]  }
   0x1   :  { %s1666_s11 = smov 0  }
   0x2 LB: > { %s31_s12 = sadd.s32 1, %s1626_s10  ;;  %p1320_p0 = scmp.ge.s32.totalorder %s1630_s11, 1  ;;  %s1630_s11 = sphi %s1666_s11, %s12_s11   ;;  %s1626_s10 = sphi %s1664_s10, %s1881_s10   ;;  %s1622_s9 = sphi %s1662_s9, %s1880_s9  }
   0x3   : > { %p33_p1 = scmp.ge.s32.totalorder %s31_s12, 2  ;;  %p153_p2 = scmp.lt.s32.totalorder %s1630_s11, 3 }
   0x5   : > { %s1883_s12 = smov (%p33_p1, %s31_s12), 0  ;;  %p154_p3 = pnand %p1320_p0, %p153_p2 }
   0x6   : > { %s1321_s13 = sshll.u32 (!%p154_p3), %s1622_s9, 1  ;;  %vm242_vm0 = vcmask (!%p154_p3), 64512   ;;  %s1632_s21 = smov (!%p154_p3), 96   ;;  %vm332_vm2 = vcmask (!%p154_p3), 130048   ;;  %vm231_vm3 = vcmask (!%p154_p3), 261120   ;;  %vm1136_vm4 = vcmask (!%p154_p3), 195584  }
   0x7   : > { %157 = sbr.rel (%p154_p3) target bundleno = 2003 (0x7d3), region = 28  ;;  %p185_p4 = scmp.lt.s32.totalorder (!%p154_p3), %s1321_s13, 3  ;;  %vm1699_vm1 = vmpackc.low (!%p154_p3), %vm242_vm0, %vm242_vm0 }
   0x8   : > { %s1633_s22 = smov (!%p154_p3), 64   ;;  %s1634_s23 = smov (!%p154_p3), 88  }
   0x9   : > { %s1635_s24 = smov (!%p154_p3), 120   ;;  %s1636_s25 = smov (!%p154_p3), 56  }
   0xa   : > { %s1637_s26 = smov (!%p154_p3), 80   ;;  %s1638_s27 = smov (!%p154_p3), 112  }
   0xb   : > { %s1639_s28 = smov (!%p154_p3), 48   ;;  %s1640_s29 = smov (!%p154_p3), 72  }
   0xc   : > { %s1641_s30 = smov (!%p154_p3), 104   ;;  %s1642_s3 = smov (!%p154_p3), 40  }
   0xd   : > { %s1643_s4 = smov (!%p154_p3), 8   ;;  %s1644_s5 = smov (!%p154_p3), 16  }
   0xe   : > { %s1885_s13 = smov (!%p185_p4, %s1321_s13), 3  ;;  %s1646_s6 = smov 24  }
   0xf   : > { %s1680_s14 = sshll.u32 %s1885_s13, 3 }
  0x10   : > { %s196_s17 = scalar_lea.vmem %s1876_s1, %s1680_s14  ;;  %s188_s20 = scalar_lea.vmem %s1875_s0, %s1680_s14 }
  0x11   : > { %v207_v0 = vld [vmem:[%s196_s17] sm:$0xff]  ;;  %v208_v1 = vld [vmem:[%s196_s17 + $0x8] sm:$0xff]  ;;  %s204_s9 = scalar_lea.vmem %s1877_s2, %s1680_s14 }
  0x12   : > { %v209_v2 = vld [vmem:[%s188_s20] sm:$0xff]  ;;  %v1690_v3 = vpack.i.bf16 %v208_v1, %v207_v0  ;;  %v210_v10 = vld [vmem:[%s188_s20 + $0x8] sm:$0xff] }
  0x13   : > { %v1692_v4 = vmul.f32 0.17677669, %v209_v2  ;;  %v1707_v11 = vmul.f32 0.17677669, %v210_v10 }
  0x14   : > { %1521 = vrot.lane.b32.xlu0 %v1690_v3, %s1632_s21 }
  0x15   : > { %1389 = vmatprep.mubr.msk.f32.mxu0 %vm242_vm0, %v1692_v4 }
  0x86   : > { %v1522_v5 = vpop.permute.xlu0 %1521 }
  0x87   : > { %v1524_v6 = vunpack.i.h.bf16 %v1522_v5  ;;  %v1523_v7 = vunpack.i.l.bf16 %v1522_v5 }
  0x89   : > { %v1441_v9 = vpack.c.bf16 %v1524_v6, %v1523_v7 }
  0x8b   : > { %1443 = vmatprep.subr.msk.bf16.mxu0 %vm1699_vm1, %v1441_v9 }
  0x8c   : > { %1446 = vmatpush3.bf16.xpose.msk.msra.mxu0 %vm1699_vm1, %v1441_v9 }
  0x93   : > { %1390 = vmatmul.mubr.msk.f32.vlgmr.msra.gmra.mrb[0].mxu0 %vm242_vm0, %v1707_v11 }
 0x166   : > { %v1391_v12 = vpop.f32.mrb[0].mxu0 }
 0x167   : > { %v319_v13 = vpop.f32.mrb[1].mxu0  ;;  %v336_v14 = vsel %vm332_vm2, %v1391_v12, -inf }
 0x168   : > { %337 = vmax.xlane.f32.xlu1 %v336_v14  ;;  %v333_v15 = vsel %vm332_vm2, %v319_v13, -inf }
 0x169   : > { %334 = vmax.xlane.f32.xlu0 %v333_v15 }
 0x179   : > { %1526 = vrot.lane.b32.xlu1 %v1690_v3, %s1633_s22 }
 0x17d   : > { %1531 = vrot.lane.b32.xlu1 %v1690_v3, %s1634_s23 }
 0x181   : > { %454 = vrot.lane.b32.xlu1 %v1692_v4, %s1635_s24 }
 0x185   : > { %456 = vrot.lane.b32.xlu1 %v1707_v11, %s1635_s24 }
 0x1f5   : > { %v1717_v16 = vpop.xlane.xlu1 %337 }
 0x1f6   : > { %v348_v17 = vsub.f32 %v1391_v12, %v1717_v16  ;;  %v1720_v18 = vpop.xlane.xlu0 %334 }
 0x1f7   : > { %v347_v19 = vsub.f32 %v319_v13, %v1720_v18 }
 0x1f8   : > { %v351_v22 = vmul.f32 1.442695, %v348_v17 }
 0x1f9   : > { %v349_v20 = vmul.f32 1.442695, %v347_v19  ;;  %v1527_v21 = vpop.permute.xlu1 %1526 }
 0x1fa   : > { %v1529_v23 = vunpack.i.h.bf16 %v1527_v21  ;;  %v1528_v24 = vunpack.i.l.bf16 %v1527_v21 }
 0x1fb   : > { %1560 = vpow2.f32 %v349_v20 }
 0x1fc   : > { %v1447_v25 = vpack.c.bf16 %v1529_v23, %v1528_v24  ;;  %1562 = vpow2.f32 %v351_v22 }
 0x1fd   : > { %v1532_v26 = vpop.permute.xlu1 %1531 }
 0x1fe   : > { %1448 = vmatprep.subr.bf16.mxu1 %v1447_v25  ;;  %v1534_v27 = vunpack.i.h.bf16 %v1532_v26  ;;  %v1533_v28 = vunpack.i.l.bf16 %v1532_v26 }
 0x1ff   : > { %1450 = vmatpush3.bf16.msra.mxu1 %v1447_v25 }
 0x200   : > { %v1451_v29 = vpack.c.bf16 %v1534_v27, %v1533_v28 }
 0x201   : > { %v455_v31 = vpop.permute.xlu1 %454 }
 0x202   : > { %1453 = vmatprep.subr.msk.bf16.mxu1 %vm1699_vm1, %v1451_v29 }
 0x205   : > { %v1725_v30 = vpop.eup %1560  ;;  %v457_v33 = vpop.permute.xlu1 %456 }
 0x206   : > { %v1727_v32 = vpop.eup %1562  ;;  %1396 = vmatprep.mubr.msk.f32.mxu1 %vm332_vm2, %v1725_v30 }
 0x207   : > { %1397 = vmatmul.mubr.msk.f32.vlgmr.msra.gmra.mrb[0].mxu1 %vm332_vm2, %v1727_v32 }
 0x208   : > { %1456 = vmatpush3.bf16.xpose.msk.msra.mxu1 %vm1699_vm1, %v1451_v29  ;;  %1403 = vmatprep.mubr.msk.f32.mxu1 %vm242_vm0, %v455_v31 }
 0x20f   : > { %1404 = vmatmul.mubr.msk.f32.vlgmr.msra.gmra.mrb[2].mxu1 %vm242_vm0, %v457_v33  ;;  %v358_v33 = vsel %vm332_vm2, %v1727_v32, 0.0  ;;  %v1645_v32 = vmov 0.0  }
 0x210   : > { %233 = vst.msk [vmem:[#allocation4 + $0x8] sm:$0xff] %vm231_vm3, %v1645_v32  ;;  %232 = vst.msk [vmem:[#allocation4] sm:$0xff] %vm231_vm3, %v1645_v32 }
 0x2da   : > { %v1737_v34 = vpop.f32.mrb[0].mxu1 }
 0x2db   : > { %v1739_v35 = vpop.f32.mrb[1].mxu1 }
 0x2e2   : > { %v1405_v36 = vpop.f32.mrb[2].mxu1 }
 0x2e3   : > { %v536_v37 = vpop.f32.mrb[3].mxu1  ;;  %v554_v38 = vsel %vm332_vm2, %v1405_v36, -inf }
 0x2e4   : > { %555 = vmax.xlane.f32.xlu0 %v554_v38  ;;  %v551_v39 = vsel %vm332_vm2, %v536_v37, -inf }
 0x2e5   : > { %552 = vmax.xlane.f32.xlu1 %v551_v39 }
 0x2f6   : > { %1546 = vrot.lane.b32.xlu1 %v1690_v3, %s1639_s28 }
 0x2fa   : > { %1536 = vrot.lane.b32.xlu0 %v1690_v3, %s1636_s25  ;;  %1551 = vrot.lane.b32.xlu1 %v1690_v3, %s1640_s29 }
 0x2fe   : > { %1541 = vrot.lane.b32.xlu0 %v1690_v3, %s1637_s26 }
 0x302   : > { %672 = vrot.lane.b32.xlu0 %v1692_v4, %s1638_s27 }
 0x306   : > { %674 = vrot.lane.b32.xlu0 %v1707_v11, %s1638_s27 }
 0x371   : > { %v1749_v40 = vpop.xlane.xlu0 %555 }
 0x372   : > { %v566_v41 = vsub.f32 %v1405_v36, %v1749_v40  ;;  %v1752_v42 = vpop.xlane.xlu1 %552  ;;  %v560_v36 = vsub.f32 -inf, %v1749_v40 }
 0x373   : > { %v565_v43 = vsub.f32 %v536_v37, %v1752_v42 }
 0x374   : > { %v569_v46 = vmul.f32 1.442695, %v566_v41  ;;  %v563_v37 = vmul.f32 1.442695, %v560_v36 }
 0x375   : > { %v567_v44 = vmul.f32 1.442695, %v565_v43  ;;  %v1537_v45 = vpop.permute.xlu0 %1536 }
 0x376   : > { %v1539_v47 = vunpack.i.h.bf16 %v1537_v45  ;;  %v1538_v48 = vunpack.i.l.bf16 %v1537_v45  ;;  %v1547_v58 = vpop.permute.xlu1 %1546 }
 0x377   : > { %1564 = vpow2.f32 %v567_v44  ;;  %v1549_v59 = vunpack.i.h.bf16 %v1547_v58  ;;  %v1548_v60 = vunpack.i.l.bf16 %v1547_v58 }
 0x378   : > { %v1457_v49 = vpack.c.bf16 %v1539_v47, %v1538_v48  ;;  %1566 = vpow2.f32 %v569_v46 }
 0x379   : > { %v1542_v50 = vpop.permute.xlu0 %1541  ;;  %v1467_v61 = vpack.c.bf16 %v1549_v59, %v1548_v60  ;;  %v559_v59 = vsub.f32 -inf, %v1752_v42  ;;  %v355_v60 = vsel %vm332_vm2, %v1725_v30, 0.0 }
 0x37a   : > { %1458 = vmatprep.subr.bf16.mxu0 %v1457_v49  ;;  %v1544_v51 = vunpack.i.h.bf16 %v1542_v50  ;;  %v1543_v52 = vunpack.i.l.bf16 %v1542_v50  ;;  %v1552_v62 = vpop.permute.xlu1 %1551 }
 0x37b   : > { %1460 = vmatpush3.bf16.msra.mxu0 %v1457_v49  ;;  %v1554_v63 = vunpack.i.h.bf16 %v1552_v62  ;;  %v1553_v0 = vunpack.i.l.bf16 %v1552_v62  ;;  %1468 = vmatprep.subr.bf16.mxu1 %v1467_v61 }
 0x37c   : > { %v1461_v53 = vpack.c.bf16 %v1544_v51, %v1543_v52  ;;  %1470 = vmatpush3.bf16.msra.mxu1 %v1467_v61  ;;  %v561_v61 = vmul.f32 1.442695, %v559_v59 }
 0x37d   : > { %v673_v55 = vpop.permute.xlu0 %672  ;;  %v1471_v1 = vpack.c.bf16 %v1554_v63, %v1553_v0 }
 0x37e   : > { %1463 = vmatprep.subr.msk.bf16.mxu0 %vm1699_vm1, %v1461_v53 }
 0x37f   : > { %1473 = vmatprep.subr.msk.bf16.mxu1 %vm1699_vm1, %v1471_v1 }
 0x381   : > { %v1757_v54 = vpop.eup %1564  ;;  %v675_v57 = vpop.permute.xlu0 %674 }
 0x382   : > { %v1567_v56 = vpop.eup %1566  ;;  %1410 = vmatprep.mubr.msk.f32.mxu0 %vm332_vm2, %v1757_v54  ;;  %v573_v31 = vsel %vm332_vm2, %v1757_v54, 0.0 }
 0x383   : > { %1411 = vmatmul.mubr.msk.f32.vlgmr.msra.gmra.mrb[2].mxu0 %vm332_vm2, %v1567_v56  ;;  %v576_v8 = vsel %vm332_vm2, %v1567_v56, 0.0 }
 0x384   : > { %1466 = vmatpush3.bf16.xpose.msk.msra.mxu0 %vm1699_vm1, %v1461_v53  ;;  %1417 = vmatprep.mubr.msk.f32.mxu0 %vm242_vm0, %v673_v55 }
 0x38b   : > { %1418 = vmatmul.mubr.msk.f32.vlgmr.msra.gmra.mrb[4].mxu0 %vm242_vm0, %v675_v57 }
 0x456   : > { %v1768_v2 = vpop.f32.mrb[2].mxu0 }
 0x457   : > { %v1770_v5 = vpop.f32.mrb[3].mxu0 }
 0x45e   : > { %v1419_v6 = vpop.f32.mrb[4].mxu0 }
 0x45f   : > { %v754_v7 = vpop.f32.mrb[5].mxu0  ;;  %v772_v9 = vsel %vm332_vm2, %v1419_v6, -inf }
 0x460   : > { %773 = vmax.xlane.f32.xlu0 %v772_v9  ;;  %v769_v10 = vsel %vm332_vm2, %v754_v7, -inf }
 0x461   : > { %770 = vmax.xlane.f32.xlu1 %v769_v10 }
 0x472   : > { %890 = vrot.lane.b32.xlu1 %v1692_v4, %s1641_s30 }
 0x476   : > { %892 = vrot.lane.b32.xlu1 %v1707_v11, %s1641_s30 }
 0x4ed   : > { %v774_v12 = vpop.xlane.xlu0 %773 }
 0x4ee   : > { %v784_v13 = vsub.f32 %v1419_v6, %v774_v12  ;;  %v1776_v14 = vpop.xlane.xlu1 %770  ;;  %v778_v38 = vsub.f32 -inf, %v774_v12 }
 0x4ef   : > { %v783_v15 = vsub.f32 %v754_v7, %v1776_v14  ;;  %v777_v62 = vsub.f32 -inf, %v1776_v14 }
 0x4f0   : > { %v787_v19 = vmul.f32 1.442695, %v784_v13  ;;  %v781_v39 = vmul.f32 1.442695, %v778_v38 }
 0x4f1   : > { %v785_v17 = vmul.f32 1.442695, %v783_v15  ;;  %v779_v63 = vmul.f32 1.442695, %v777_v62 }
 0x4f2   : > { %v891_v21 = vpop.permute.xlu1 %890 }
 0x4f3   : > { %1568 = vpow2.f32 %v785_v17 }
 0x4f4   : > { %1570 = vpow2.f32 %v787_v19 }
 0x4f5   : > { %1572 = vpow2.f32 %v563_v37 }
 0x4f6   : > { %v893_v4 = vpop.permute.xlu1 %892  ;;  %1574 = vpow2.f32 %v781_v39 }
 0x4fd   : > { %v1569_v20 = vpop.eup %1568 }
 0x4fe   : > { %v1571_v22 = vpop.eup %1570  ;;  %1424 = vmatprep.mubr.msk.f32.mxu1 %vm332_vm2, %v1569_v20  ;;  %v791_v28 = vsel %vm332_vm2, %v1569_v20, 0.0 }
 0x4ff   : > { %1425 = vmatmul.mubr.msk.f32.vlgmr.msra.gmra.mrb[4].mxu1 %vm332_vm2, %v1571_v22  ;;  %v794_v29 = vsel %vm332_vm2, %v1571_v22, 0.0  ;;  %v1573_v41 = vpop.eup %1572 }
 0x500   : > { %1476 = vmatpush3.bf16.xpose.msk.msra.mxu1 %vm1699_vm1, %v1471_v1  ;;  %1431 = vmatprep.mubr.msk.f32.mxu1 %vm242_vm0, %v891_v21  ;;  %v572_v10 = vmul.f32 0.0, %v1573_v41 }
 0x507   : > { %1432 = vmatmul.mubr.msk.f32.vlgmr.msra.gmra.mrb[6].mxu1 %vm242_vm0, %v893_v4 }
 0x5d2   : > { %v1785_v11 = vpop.f32.mrb[4].mxu1 }
 0x5d3   : > { %v1787_v23 = vpop.f32.mrb[5].mxu1 }
 0x5da   : > { %v1433_v24 = vpop.f32.mrb[6].mxu1 }
 0x5db   : > { %v972_v25 = vpop.f32.mrb[7].mxu1  ;;  %v990_v26 = vsel %vm332_vm2, %v1433_v24, -inf }
 0x5dc   : > { %991 = vmax.xlane.f32.xlu0 %v990_v26  ;;  %v987_v27 = vsel %vm332_vm2, %v972_v25, -inf }
 0x5dd   : > { %988 = vmax.xlane.f32.xlu1 %v987_v27 }
 0x5e1   : > { %577 = vadd.xlane.f32.xlu1 %v576_v8 }
 0x5e5   : > { %792 = vadd.xlane.f32.xlu1 %v791_v28 }
 0x5e9   : > { %795 = vadd.xlane.f32.xlu1 %v794_v29 }
 0x5f2   : > { %1556 = vrot.lane.b32.xlu0 %v1690_v3, %s1642_s3  ;;  %v1801_v3 = vpop.eup %1574 }
 0x611   : > { %574 = vadd.xlane.f32.xlu0 %v573_v31 }
 0x615   : > { %359 = vadd.xlane.f32.xlu0 %v358_v33 }
 0x62b   : > { %1143 = vrot.lane.b32.xlu0 %v1573_v41, %s1643_s4  ;;  %v342_v41 = vsub.f32 -inf, %v1717_v16 }
 0x62d   : > { %v345_v32 = vmul.f32 1.442695, %v342_v41 }
 0x62f   : > { %1151 = vrot.lane.b32.xlu0 %v1801_v3, %s1644_s5 }
 0x633   : > { %1112 = vrot.lane.b32.xlu0 %v1768_v2, %s1643_s4 }
 0x669   : > { %v992_v40 = vpop.xlane.xlu0 %991 }
 0x66a   : > { %v996_v43 = vsub.f32 -inf, %v992_v40  ;;  %v1002_v44 = vsub.f32 %v1433_v24, %v992_v40  ;;  %v989_v45 = vpop.xlane.xlu1 %988 }
 0x66b   : > { %v1001_v46 = vsub.f32 %v972_v25, %v989_v45  ;;  %v995_v0 = vsub.f32 -inf, %v989_v45 }
 0x66c   : > { %v999_v47 = vmul.f32 1.442695, %v996_v43  ;;  %v1005_v50 = vmul.f32 1.442695, %v1002_v44 }
 0x66d   : > { %v1003_v48 = vmul.f32 1.442695, %v1001_v46  ;;  %v1557_v49 = vpop.permute.xlu0 %1556  ;;  %v997_v1 = vmul.f32 1.442695, %v995_v0 }
 0x66e   : > { %1576 = vpow2.f32 %v999_v47  ;;  %v1559_v51 = vunpack.i.h.bf16 %v1557_v49  ;;  %v1558_v52 = vunpack.i.l.bf16 %v1557_v49  ;;  %v578_v42 = vpop.xlane.xlu1 %577 }
 0x66f   : > { %1578 = vpow2.f32 %v1003_v48  ;;  %v580_v15 = vadd.f32 %v578_v42, %v572_v10 }
 0x670   : > { %v1477_v53 = vpack.c.bf16 %v1559_v51, %v1558_v52  ;;  %1580 = vpow2.f32 %v1005_v50 }
 0x671   : > { %1582 = vpow2.f32 %v561_v61  ;;  %v1169_v61 = vld [vmem:[#allocation4] sm:$0xff] }
 0x672   : > { %1478 = vmatprep.subr.bf16.mxu0 %v1477_v53  ;;  %1584 = vpow2.f32 %v779_v63  ;;  %v793_v7 = vpop.xlane.xlu1 %792 }
 0x673   : > { %1480 = vmatpush3.bf16.msra.mxu0 %v1477_v53  ;;  %1586 = vpow2.f32 %v997_v1 }
 0x674   : > { %1588 = vrcp.f32 %v580_v15 }
 0x676   : > { %v796_v9 = vpop.xlane.xlu1 %795 }
 0x678   : > { %v1577_v54 = vpop.eup %1576 }
 0x679   : > { %1159 = vrot.lane.b32.xlu0 %v1577_v54, %s1646_s6  ;;  %v1579_v55 = vpop.eup %1578  ;;  %v1008_v4 = vmul.f32 0.0, %v1577_v54 }
 0x67a   : > { %v1581_v56 = vpop.eup %1580  ;;  %1438 = vmatprep.mubr.msk.f32.mxu0 %vm332_vm2, %v1579_v55  ;;  %v1009_v57 = vsel %vm332_vm2, %v1579_v55, 0.0 }
 0x67b   : > { %1439 = vmatmul.mubr.msk.f32.vlgmr.msra.gmra.mrb[6].mxu0 %vm332_vm2, %v1581_v56  ;;  %1010 = vadd.xlane.f32.xlu1 %v1009_v57  ;;  %v1012_v58 = vsel %vm332_vm2, %v1581_v56, 0.0  ;;  %v1583_v2 = vpop.eup %1582  ;;  %v1170_v57 = vld [vmem:[#allocation4 + $0x8] sm:$0xff] }
 0x67c   : > { %v1585_v6 = vpop.eup %1584  ;;  %v571_v13 = vmul.f32 0.0, %v1583_v2 }
 0x67d   : > { %v1587_v30 = vpop.eup %1586  ;;  %v789_v19 = vmul.f32 0.0, %v1585_v6 }
 0x67e   : > { %v1589_v27 = vpop.eup %1588 }
 0x67f   : > { %1013 = vadd.xlane.f32.xlu1 %v1012_v58  ;;  %v797_v21 = vadd.f32 %v793_v7, %v789_v19 }
 0x683   : > { %356 = vadd.xlane.f32.xlu1 %v355_v60 }
 0x694   : > { %1141 = vrot.lane.b32.xlu1 %v1583_v2, %s1643_s4 }
 0x698   : > { %1149 = vrot.lane.b32.xlu1 %v1585_v6, %s1644_s5 }
 0x69c   : > { %1110 = vrot.lane.b32.xlu1 %v1770_v5, %s1643_s4  ;;  %v790_v5 = vmul.f32 0.0, %v1801_v3  ;;  %v341_v3 = vsub.f32 -inf, %v1720_v18 }
 0x69e   : > { %v575_v12 = vpop.xlane.xlu0 %574  ;;  %v798_v20 = vadd.f32 %v796_v9, %v790_v5  ;;  %v343_v40 = vmul.f32 1.442695, %v341_v3 }
 0x69f   : > { %v579_v17 = vadd.f32 %v575_v12, %v571_v13 }
 0x6a0   : > { %1157 = vrot.lane.b32.xlu1 %v1587_v30, %s1646_s6 }
 0x6a1   : > { %1590 = vrcp.f32 %v579_v17 }
 0x6a2   : > { %1592 = vrcp.f32 %v798_v20  ;;  %v360_v38 = vpop.xlane.xlu0 %359 }
 0x6a3   : > { %1594 = vrcp.f32 %v797_v21 }
 0x6a4   : > { %1118 = vrot.lane.b32.xlu1 %v1787_v23, %s1644_s5  ;;  %v1007_v23 = vmul.f32 0.0, %v1587_v30 }
 0x6a6   : > { %v1144_v43 = vpop.permute.xlu0 %1143 }
 0x6a8   : > { %1120 = vrot.lane.b32.xlu1 %v1785_v11, %s1644_s5 }
 0x6aa   : > { %v1152_v45 = vpop.permute.xlu0 %1151 }
 0x6ab   : > { %v1591_v8 = vpop.eup %1590 }
 0x6ac   : > { %v1593_v28 = vpop.eup %1592 }
 0x6ad   : > { %v1595_v29 = vpop.eup %1594 }
 0x6ae   : > { %v1113_v47 = vpop.permute.xlu0 %1112 }
 0x6af   : > { %v1133_v63 = vsel %vm242_vm0, %v1737_v34, %v1113_v47 }
 0x6eb   : > { %v1160_v52 = vpop.permute.xlu0 %1159 }
 0x708   : > { %v1011_v14 = vpop.xlane.xlu1 %1010 }
 0x709   : > { %v1015_v24 = vadd.f32 %v1011_v14, %v1007_v23 }
 0x70c   : > { %v1014_v22 = vpop.xlane.xlu1 %1013 }
 0x70d   : > { %v1016_v11 = vadd.f32 %v1014_v22, %v1008_v4 }
 0x70f   : > { %1596 = vrcp.f32 %v1016_v11 }
 0x710   : > { %1598 = vrcp.f32 %v1015_v24  ;;  %v357_v36 = vpop.xlane.xlu1 %356 }
 0x711   : > { %1600 = vpow2.f32 %v345_v32 }
 0x712   : > { %1602 = vpow2.f32 %v343_v40 }
 0x714   : > { %v1142_v37 = vpop.permute.xlu1 %1141 }
 0x718   : > { %v1150_v39 = vpop.permute.xlu1 %1149 }
 0x719   : > { %v1597_v31 = vpop.eup %1596 }
 0x71a   : > { %v1599_v33 = vpop.eup %1598 }
 0x71b   : > { %v1601_v49 = vpop.eup %1600 }
 0x71c   : > { %v1111_v44 = vpop.permute.xlu1 %1110  ;;  %v1603_v50 = vpop.eup %1602  ;;  %v354_v51 = vmul.f32 0.0, %v1601_v49  ;;  %v1164_v53 = vsel %vm242_vm0, %v1601_v49, %v1144_v43 }
 0x71d   : > { %v353_v16 = vmul.f32 0.0, %v1603_v50  ;;  %v1166_v18 = vsel %vm332_vm2, %v1164_v53, %v1152_v45  ;;  %v1163_v55 = vsel %vm242_vm0, %v1603_v50, %v1142_v37  ;;  %v1132_v1 = vsel %vm242_vm0, %v1739_v35, %v1111_v44 }
 0x71e   : > { %v362_v54 = vadd.f32 %v360_v38, %v354_v51  ;;  %v1168_v58 = vsel %vm1136_vm4, %v1166_v18, %v1160_v52  ;;  %v1165_v60 = vsel %vm332_vm2, %v1163_v55, %v1150_v39 }
 0x71f   : > { %v361_v59 = vadd.f32 %v357_v36, %v353_v16  ;;  %v1172_v0 = vmul.f32 %v1170_v57, %v1168_v58 }
 0x720   : > { %v1158_v46 = vpop.permute.xlu1 %1157  ;;  %1604 = vrcp.f32 %v362_v54 }
 0x721   : > { %v1167_v62 = vsel %vm1136_vm4, %v1165_v60, %v1158_v46  ;;  %1606 = vrcp.f32 %v361_v59 }
 0x722   : > { %v1171_v30 = vmul.f32 %v1169_v61, %v1167_v62 }
 0x724   : > { %v1119_v48 = vpop.permute.xlu1 %1118 }
 0x725   : > { %v1134_v42 = vsel %vm332_vm2, %v1132_v1, %v1119_v48 }
 0x728   : > { %v1121_v56 = vpop.permute.xlu1 %1120 }
 0x729   : > { %v1135_v2 = vsel %vm332_vm2, %v1133_v63, %v1121_v56 }
 0x72a   : > { %v1605_v17 = vpop.eup %1604 }
 0x72b   : > { %v1607_v5 = vpop.eup %1606 }
 0x74e   : > { %v1440_v25 = vpop.f32.mrb[6].mxu0 }
 0x74f   : > { %v1099_v26 = vpop.f32.mrb[7].mxu0  ;;  %1128 = vrot.lane.b32.xlu1 %v1440_v25, %s1646_s6 }
 0x750   : > { %1126 = vrot.lane.b32.xlu0 %v1099_v26, %s1646_s6 }
 0x753   : > { %1201 = vrot.lane.b32.xlu1 %v1589_v27, %s1643_s4 }
 0x754   : > { %1199 = vrot.lane.b32.xlu0 %v1591_v8, %s1643_s4 }
 0x757   : > { %1209 = vrot.lane.b32.xlu1 %v1593_v28, %s1644_s5 }
 0x758   : > { %1207 = vrot.lane.b32.xlu0 %v1595_v29, %s1644_s5 }
 0x75b   : > { %1217 = vrot.lane.b32.xlu1 %v1597_v31, %s1646_s6 }
 0x75c   : > { %1215 = vrot.lane.b32.xlu0 %v1599_v33, %s1646_s6 }
 0x7c1   : > { %v1129_v6 = vpop.permute.xlu1 %1128 }
 0x7c2   : > { %v1138_v7 = vsel %vm1136_vm4, %v1135_v2, %v1129_v6  ;;  %v1127_v9 = vpop.permute.xlu0 %1126 }
 0x7c3   : > { %v1174_v10 = vadd.f32 %v1172_v0, %v1138_v7  ;;  %v1137_v12 = vsel %vm1136_vm4, %v1134_v42, %v1127_v9 }
 0x7c4   : > { %v1173_v13 = vadd.f32 %v1171_v30, %v1137_v12 }
 0x7c5   : > { %1177 = vst.msk [vmem:[#allocation4 + $0x8] sm:$0xff] %vm231_vm3, %v1174_v10  ;;  %v1202_v34 = vpop.permute.xlu1 %1201 }
 0x7c6   : > { %1176 = vst.msk [vmem:[#allocation4] sm:$0xff] %vm231_vm3, %v1173_v13  ;;  %v1200_v35 = vpop.permute.xlu0 %1199  ;;  %v1222_v19 = vsel %vm242_vm0, %v1605_v17, %v1202_v34 }
 0x7c7   : > { %v1221_v20 = vsel %vm242_vm0, %v1607_v5, %v1200_v35 }
 0x7c9   : > { %v1210_v14 = vpop.permute.xlu1 %1209 }
 0x7ca   : > { %v1208_v15 = vpop.permute.xlu0 %1207  ;;  %v1224_v21 = vsel %vm332_vm2, %v1222_v19, %v1210_v14 }
 0x7cb   : > { %v1223_v4 = vsel %vm332_vm2, %v1221_v20, %v1208_v15 }
 0x7cc   : > { %v1228_v26 = vld [vmem:[#allocation4 + $0x8] sm:$0xff] }
 0x7cd   : > { %v1218_v22 = vpop.permute.xlu1 %1217  ;;  %v1227_v25 = vld [vmem:[#allocation4] sm:$0xff] }
 0x7ce   : > { %v1226_v23 = vsel %vm1136_vm4, %v1224_v21, %v1218_v22  ;;  %v1216_v11 = vpop.permute.xlu0 %1215 }
 0x7cf   : > { %v1225_v24 = vsel %vm1136_vm4, %v1223_v4, %v1216_v11  ;;  %v1230_v8 = vmul.f32 %v1228_v26, %v1226_v23 }
 0x7d0   : > { %v1229_v27 = vmul.f32 %v1227_v25, %v1225_v24 }
 0x7d1   : > { %1232 = vst.msk [vmem:[%s204_s9 + $0x8] sm:$0xff] %vm231_vm3, %v1230_v8 }
 0x7d2   : > { %1231 = vst.msk [vmem:[%s204_s9] sm:$0xff] %vm231_vm3, %v1229_v27 }
 0x7d3 PF: > { %s12_s11 = sadd.s32 1, %s1630_s11   ;;  %s1880_s9 = smov %s1626_s10 }
 0x7d4   : > { %p9_p5 = scmp.ge.s32.totalorder %s12_s11, 4   ;;  %s1881_s10 = smov %s1883_s12 }
 0x7d6   :  { %11 = sbr.rel (!%p9_p5) target bundleno = 2 (0x2), region = 75 }

</bundles_post_ra>
